<compile_context>
chip_gen: v6e
topology: v6e:2x2x1
jax: 0.10.0
libtpu: 0.0.40
codegen_flags: <defaults>
</compile_context>

<pallas_src>
import functools

import jax
import jax.numpy as jnp
from jax.experimental import pallas as pl
from jax.experimental.pallas import tpu as pltpu

_LANE = 128
_SUBLANE = 8


def _round_up(x, m):
    return ((x + m - 1) // m) * m


def _vmem():
    return pl.BlockSpec(memory_space=pltpu.MemorySpace.VMEM)


def _pad2(x, rows, cols):
    r, c = x.shape
    if (r, c) == (rows, cols):
        return x
    return jnp.zeros((rows, cols), x.dtype).at[:r, :c].set(x)


def _pad3(x, d0, d1, d2):
    a, b, c = x.shape
    if (a, b, c) == (d0, d1, d2):
        return x
    return jnp.zeros((d0, d1, d2), x.dtype).at[:a, :b, :c].set(x)


def _pad_gate_weight(w, H, H_pad, rows_pad):
    """Pad a PyTorch-layout [i|f|g|o] gate weight (rows, 4H) -> (rows_pad, 4*H_pad).

    Each gate's columns are scattered to a lane-aligned 128-multiple offset
    k*H_pad so the kernel slices gates with lane-aligned 128-wide windows.
    """
    rows = w.shape[0]
    out = jnp.zeros((rows_pad, 4 * H_pad), w.dtype)
    for k in range(4):
        out = out.at[:rows, k * H_pad:k * H_pad + H].set(w[:, k * H:(k + 1) * H])
    return out


# --------------------------- fused decoder kernel ----------------------------
def _fused_decoder_kernel(*refs, num_layers, input_feed, att_nth,
                          gate_type, scale_src, scale_tgt):
    it = iter(refs)
    dec_in_ref = next(it)                       # (B, IN_pad)
    cpp_ref = next(it)                          # (B, CP_pad)  ctx_proj_prev
    ctx_ref = next(it)                          # (B, T, C_pad)
    cmask_ref = next(it)                        # (B, T)
    dmask_ref = next(it)                        # (B, 1)
    state_refs = [(next(it), next(it)) for _ in range(num_layers)]   # (h, c)
    layer_w = []
    for ii in range(num_layers):
        if ii == input_feed:
            layer_w.append(tuple(next(it) for _ in range(4)))   # w_x, w_cp, w_hh, b
        else:
            layer_w.append(tuple(next(it) for _ in range(3)))   # w_ih, w_hh, b
    wq_ref = next(it)
    n_proj = 3 if gate_type is None else 7
    proj_refs = tuple(next(it) for _ in range(n_proj))
    # outputs
    out_ref = next(it)                          # (B, OUT_pad)
    ec_ref = next(it)                           # (B, C_pad)
    alpha_ref = next(it)                        # (B, T)
    cpp_out_ref = next(it)                      # (B, CP_pad)
    state_out_refs = [(next(it), next(it)) for _ in range(num_layers)]

    dec_mask = dmask_ref[...]                   # (B, 1) broadcasts across lanes
    x_below = dec_in_ref[...]

    for ii in range(num_layers):
        h_prev = state_refs[ii][0][...]
        c_prev = state_refs[ii][1][...]
        if ii == input_feed:
            # input feeding: two dots instead of a host-side concat
            w_x, w_cp, w_hh, b = layer_w[ii]
            gates = (jnp.dot(x_below, w_x[...], preferred_element_type=jnp.float32)
                     + jnp.dot(cpp_ref[...], w_cp[...],
                               preferred_element_type=jnp.float32)
                     + jnp.dot(h_prev, w_hh[...], preferred_element_type=jnp.float32)
                     + b[...])
        else:
            w_ih, w_hh, b = layer_w[ii]
            gates = (jnp.dot(x_below, w_ih[...], preferred_element_type=jnp.float32)
                     + jnp.dot(h_prev, w_hh[...], preferred_element_type=jnp.float32)
                     + b[...])
        H = h_prev.shape[1]                     # padded to a 128 multiple
        i_g = jax.nn.sigmoid(gates[:, 0 * H:1 * H])   # lane-aligned 128-wide slices
        f_g = jax.nn.sigmoid(gates[:, 1 * H:2 * H])
        g_g = jnp.tanh(gates[:, 2 * H:3 * H])
        o_g = jax.nn.sigmoid(gates[:, 3 * H:4 * H])
        c_new = f_g * c_prev + i_g * g_g
        h_new = o_g * jnp.tanh(c_new)
        state_out_refs[ii][0][...] = h_new
        state_out_refs[ii][1][...] = c_new

        res = h_new * dec_mask
        # dropout omitted: eval mode (training=False) -> identity, exact.
        if ii == att_nth:
            h_t = res
            ctx = ctx_ref[...]                  # (B, T, C_pad)
            cmask = cmask_ref[...]              # (B, T)
            # Luong "general": score = ctx . (W_q h), expressed as MXU contractions
            qp = jnp.dot(h_t, wq_ref[...], preferred_element_type=jnp.float32)
            scores = jnp.einsum('bqc,btc->bqt', qp[:, None, :], ctx,
                                preferred_element_type=jnp.float32)[:, 0, :]
            scores = jnp.where(cmask > 0, scores, -1e30)
            m = jnp.max(scores, axis=1, keepdims=True)
            e = jnp.exp(scores - m) * cmask
            denom = jnp.maximum(jnp.sum(e, axis=1, keepdims=True), 1e-30)
            alpha = e / denom
            ec = jnp.einsum('bqt,btc->bqc', alpha[:, None, :], ctx,
                            preferred_element_type=jnp.float32)[:, 0, :]
            ec_ref[...] = ec
            alpha_ref[...] = alpha
            src = ec * scale_src if scale_src != 1.0 else ec
            tgt = h_t * scale_tgt if scale_tgt != 1.0 else h_t
            if gate_type is None:
                w_t, w_s, b_p = proj_refs
                res = jnp.tanh(
                    jnp.dot(tgt, w_t[...], preferred_element_type=jnp.float32)
                    + jnp.dot(src, w_s[...], preferred_element_type=jnp.float32)
                    + b_p[...])
            else:
                wg_s, wg_t, bg, ws, bs, wt, bt = proj_refs
                z = jax.nn.sigmoid(
                    jnp.dot(src, wg_s[...], preferred_element_type=jnp.float32)
                    + jnp.dot(tgt, wg_t[...], preferred_element_type=jnp.float32)
                    + bg[...])
                ps = jnp.dot(src, ws[...], preferred_element_type=jnp.float32) + bs[...]
                pt = jnp.dot(tgt, wt[...], preferred_element_type=jnp.float32) + bt[...]
                if gate_type == 'all':
                    gated = z * ps + (1.0 - z) * pt
                elif gate_type == 'src':
                    gated = z * ps + pt
                else:                            # 'tgt'
                    gated = ps + (1.0 - z) * pt
                res = jnp.tanh(gated)
            res = res * dec_mask
            cpp_out_ref[...] = res               # next-step ctx_proj_prev
        x_below = res
    out_ref[...] = x_below


# ------------------------------- parameters ----------------------------------
def init_params(key, in_size, ctx_size, rnn_sizes, ctx_proj_size,
                input_feed, att_nth, ctx_gate):
    def lin(k, fan_in, fan_out):
        k1, k2 = jax.random.split(k)
        w = jax.random.uniform(k1, (fan_in, fan_out), jnp.float32, -0.1, 0.1)
        b = jax.random.uniform(k2, (1, fan_out), jnp.float32, -0.1, 0.1)
        return w, b

    keys = iter(jax.random.split(key, 32))
    params = {}
    prev = in_size
    for ii, H in enumerate(rnn_sizes):
        if input_feed == ii:
            prev += ctx_proj_size
        w_ih, _ = lin(next(keys), prev, 4 * H)
        w_hh, b = lin(next(keys), H, 4 * H)      # combined bias (b_ih + b_hh)
        params['rnn%d' % ii] = {'w_ih': w_ih, 'w_hh': w_hh, 'b': b}
        prev = H
        if att_nth == ii:
            wq, _ = lin(next(keys), H, ctx_size)     # attention out_features == ctx_size
            params['att'] = {'wq': wq}
            if ctx_gate is None:
                w, b2 = lin(next(keys), H + ctx_size, ctx_proj_size)
                params['ctx_proj'] = {'w_t': w[:H], 'w_s': w[H:], 'b': b2}
            prev = ctx_proj_size
    if ctx_gate is not None:
        H_att = rnn_sizes[att_nth]
        wg, bg = lin(next(keys), ctx_size + H_att, ctx_proj_size)
        ws, bs = lin(next(keys), ctx_size, ctx_proj_size)
        wt, bt = lin(next(keys), H_att, ctx_proj_size)
        params['ctx_gate'] = {'wg_s': wg[:ctx_size], 'wg_t': wg[ctx_size:], 'bg': bg,
                              'ws': ws, 'bs': bs, 'wt': wt, 'bt': bt}
    return params


# ------------------------------- decoder class -------------------------------
class StandardDecoderPallas:
    def __init__(self, params, in_size, ctx_size, rnn_sizes, ctx_proj_size,
                 input_feed=0, att_nth_layer=-1,
                 scale_src=1.0, scale_tgt=1.0, ctx_gate=None):
        self.in_size = in_size
        self.ctx_size = ctx_size
        self.rnn_sizes = list(rnn_sizes)
        self.ctx_proj_size = ctx_proj_size
        self.input_feed = input_feed
        self.att_nth_layer = (att_nth_layer if att_nth_layer >= 0
                              else len(rnn_sizes) + att_nth_layer)
        self.scale_src = float(scale_src)
        self.scale_tgt = float(scale_tgt)
        self.ctx_gate = ctx_gate

        # padded (lane-aligned) dims
        self.in_pad = _round_up(in_size, _LANE)
        self.ctx_pad = _round_up(ctx_size, _LANE)
        self.cp_pad = _round_up(ctx_proj_size, _LANE)
        self.h_pad = [_round_up(h, _LANE) for h in self.rnn_sizes]
        last = len(self.rnn_sizes) - 1
        self.out_logical = ctx_proj_size if self.att_nth_layer == last else self.rnn_sizes[-1]
        self.out_pad = self.cp_pad if self.att_nth_layer == last else self.h_pad[-1]

        # ---- pre-pad all weights once (zero padding keeps the math exact) ----
        weights = []
        prev, prev_pad = in_size, self.in_pad
        for ii, H in enumerate(self.rnn_sizes):
            Hp = self.h_pad[ii]
            p = params['rnn%d' % ii]
            if ii == self.input_feed:
                w_x = p['w_ih'][:prev]               # rows for x_below features
                w_cp = p['w_ih'][prev:]              # rows for ctx_proj_prev features
                weights.append(_pad_gate_weight(w_x, H, Hp, prev_pad))
                weights.append(_pad_gate_weight(w_cp, H, Hp, self.cp_pad))
            else:
                weights.append(_pad_gate_weight(p['w_ih'], H, Hp, prev_pad))
            weights.append(_pad_gate_weight(p['w_hh'], H, Hp, Hp))
            weights.append(_pad_gate_weight(p['b'], H, Hp, 1))
            prev, prev_pad = H, Hp
            if ii == self.att_nth_layer:
                prev, prev_pad = ctx_proj_size, self.cp_pad
        Hp_att = self.h_pad[self.att_nth_layer]
        weights.append(_pad2(params['att']['wq'], Hp_att, self.ctx_pad))
        if ctx_gate is None:
            cp = params['ctx_proj']
            weights.append(_pad2(cp['w_t'], Hp_att, self.cp_pad))
            weights.append(_pad2(cp['w_s'], self.ctx_pad, self.cp_pad))
            weights.append(_pad2(cp['b'], 1, self.cp_pad))
        else:
            cg = params['ctx_gate']
            weights.append(_pad2(cg['wg_s'], self.ctx_pad, self.cp_pad))
            weights.append(_pad2(cg['wg_t'], Hp_att, self.cp_pad))
            weights.append(_pad2(cg['bg'], 1, self.cp_pad))
            weights.append(_pad2(cg['ws'], self.ctx_pad, self.cp_pad))
            weights.append(_pad2(cg['bs'], 1, self.cp_pad))
            weights.append(_pad2(cg['wt'], Hp_att, self.cp_pad))
            weights.append(_pad2(cg['bt'], 1, self.cp_pad))
        self._weights = weights
        self._fn_cache = {}
        self.reset()

    def reset(self):
        self._state_pad = None
        self._cpp_pad = None

    def set_ctx(self, ctx, ctx_mask):
        B, T, _ = ctx.shape
        Bp = _round_up(B, _SUBLANE)
        self._T = T
        self._ctx_p = _pad3(ctx.astype(jnp.float32), Bp, T, self.ctx_pad)
        self._cmask_p = _pad2(ctx_mask.astype(jnp.float32), Bp, T)

    def _build(self, Bp, T):
        key = (Bp, T)
        if key in self._fn_cache:
            return self._fn_cache[key]
        L = len(self.rnn_sizes)
        n_in = 5 + 2 * L + len(self._weights)
        out_shape = [jax.ShapeDtypeStruct((Bp, self.out_pad), jnp.float32),
                     jax.ShapeDtypeStruct((Bp, self.ctx_pad), jnp.float32),
                     jax.ShapeDtypeStruct((Bp, T), jnp.float32),
                     jax.ShapeDtypeStruct((Bp, self.cp_pad), jnp.float32)]
        for Hp in self.h_pad:
            out_shape += [jax.ShapeDtypeStruct((Bp, Hp), jnp.float32),
                          jax.ShapeDtypeStruct((Bp, Hp), jnp.float32)]
        kernel = functools.partial(
            _fused_decoder_kernel, num_layers=L, input_feed=self.input_feed,
            att_nth=self.att_nth_layer, gate_type=self.ctx_gate,
            scale_src=self.scale_src, scale_tgt=self.scale_tgt)
        fn = pl.pallas_call(
            kernel,
            out_shape=tuple(out_shape),
            in_specs=[_vmem() for _ in range(n_in)],
            out_specs=tuple(_vmem() for _ in range(len(out_shape))),
        )
        self._fn_cache[key] = fn
        return fn

    def __call__(self, dec_input, dec_mask=None):
        B = dec_input.shape[0]
        Bp = _round_up(B, _SUBLANE)
        T = self._T
        L = len(self.rnn_sizes)

        dec_in_p = _pad2(dec_input.astype(jnp.float32), Bp, self.in_pad)
        dm = jnp.ones((B,), jnp.float32) if dec_mask is None else dec_mask.astype(jnp.float32)
        dmask_p = _pad2(dm[:, None], Bp, 1)

        if self._state_pad is None:
            self._state_pad = [(jnp.zeros((Bp, Hp), jnp.float32),
                                jnp.zeros((Bp, Hp), jnp.float32))
                               for Hp in self.h_pad]
        if self._cpp_pad is None:
            self._cpp_pad = jnp.zeros((Bp, self.cp_pad), jnp.float32)

        state_flat = [s for hc in self._state_pad for s in hc]
        fn = self._build(Bp, T)
        outs = fn(dec_in_p, self._cpp_pad, self._ctx_p, self._cmask_p, dmask_p,
                  *state_flat, *self._weights)
        dec_out_p, ec_p, alpha_p, cpp_out_p = outs[:4]
        state_out = outs[4:]
        self._state_pad = [(state_out[2 * ii], state_out[2 * ii + 1]) for ii in range(L)]
        self._cpp_pad = cpp_out_p

        att_res = {'expected_ctx': ec_p[:B, :self.ctx_size],
                   'p_ctx': alpha_p[:B, :T]}
        return {'dec_output': dec_out_p[:B, :self.out_logical],
                'att_output': att_res}


# ---------------------------- pure-JAX reference -----------------------------
def _ref_lstm(x, h, c, w_ih, w_hh, b):
    gates = x @ w_ih + h @ w_hh + b
    H = h.shape[1]
    i = jax.nn.sigmoid(gates[:, 0 * H:1 * H])
    f = jax.nn.sigmoid(gates[:, 1 * H:2 * H])
    g = jnp.tanh(gates[:, 2 * H:3 * H])
    o = jax.nn.sigmoid(gates[:, 3 * H:4 * H])
    c_new = f * c + i * g
    return o * jnp.tanh(c_new), c_new


def ref_forward(params, cfg, dec_input, ctx, ctx_mask, dec_mask):
    rnn_sizes = cfg['rnn_sizes']
    att_nth = cfg['att_nth']
    batch = dec_input.shape[0]
    x_below = dec_input
    ctx_proj_prev = jnp.zeros((batch, cfg['ctx_proj_size']), jnp.float32)
    att_res = None
    for ii, H in enumerate(rnn_sizes):
        if cfg['input_feed'] == ii:
            x_below = jnp.concatenate([x_below, ctx_proj_prev], axis=1)
        p = params['rnn%d' % ii]
        h, _ = _ref_lstm(x_below, jnp.zeros((batch, H)), jnp.zeros((batch, H)),
                         p['w_ih'], p['w_hh'], p['b'])
        res = h
        if dec_mask is not None:
            res = res * dec_mask[:, None]
        if att_nth == ii:
            h_t = res
            qp = h_t @ params['att']['wq']
            scores = jnp.sum(ctx * qp[:, None, :], axis=-1)
            scores = jnp.where(ctx_mask > 0, scores, -1e30)
            e = jnp.exp(scores - scores.max(axis=1, keepdims=True)) * ctx_mask
            alpha = e / e.sum(axis=1, keepdims=True)
            ec = jnp.sum(alpha[:, :, None] * ctx, axis=1)
            att_res = {'expected_ctx': ec, 'p_ctx': alpha}
            src = ec * cfg['scale_src']
            tgt = h_t * cfg['scale_tgt']
            if cfg['ctx_gate'] is None:
                cp = params['ctx_proj']
                res = jnp.tanh(tgt @ cp['w_t'] + src @ cp['w_s'] + cp['b'])
            else:
                cg = params['ctx_gate']
                z = jax.nn.sigmoid(src @ cg['wg_s'] + tgt @ cg['wg_t'] + cg['bg'])
                ps = src @ cg['ws'] + cg['bs']
                pt = tgt @ cg['wt'] + cg['bt']
                if cfg['ctx_gate'] == 'all':
                    gated = z * ps + (1.0 - z) * pt
                elif cfg['ctx_gate'] == 'src':
                    gated = z * ps + pt
                else:
                    gated = ps + (1.0 - z) * pt
                res = jnp.tanh(gated)
            if dec_mask is not None:
                res = res * dec_mask[:, None]
        x_below = res
    return {'dec_output': x_below, 'att_output': att_res}


# ------------------------------------ main -----------------------------------
if __name__ == "__main__":
    B, T = 2, 8
    in_size, ctx_size = 8, 16
    rnn_sizes = [32, 32]
    ctx_proj_size = 16
    att_nth = len(rnn_sizes) - 1          # att_nth_layer = -1
    input_feed = 0
    scale_src, scale_tgt = 1.0, 1.0

    key = jax.random.PRNGKey(0)
    kp, kd, kc = jax.random.split(key, 3)
    dec_input = jax.random.normal(kd, (B, in_size), jnp.float32)
    ctx = jax.random.normal(kc, (B, T, ctx_size), jnp.float32)
    ctx_mask = jnp.concatenate(
        [jnp.ones((B, T - 2), jnp.float32), jnp.zeros((B, 2), jnp.float32)], axis=1)
    dec_mask = jnp.ones((B,), jnp.float32)

    for gate in ['all', None]:            # exercise both ContextGate and plain ctx_proj
        params = init_params(kp, in_size, ctx_size, rnn_sizes, ctx_proj_size,
                             input_feed, att_nth, gate)
        dec = StandardDecoderPallas(params, in_size, ctx_size, rnn_sizes,
                                    ctx_proj_size, input_feed=input_feed,
                                    att_nth_layer=-1, scale_src=scale_src,
                                    scale_tgt=scale_tgt, ctx_gate=gate)
        dec.set_ctx(ctx, ctx_mask)
        out = dec(dec_input, dec_mask)
        jax.block_until_ready(out['dec_output'])

        cfg = dict(rnn_sizes=rnn_sizes, att_nth=att_nth, input_feed=input_feed,
                   ctx_proj_size=ctx_proj_size, scale_src=scale_src,
                   scale_tgt=scale_tgt, ctx_gate=gate)
        ref = ref_forward(params, cfg, dec_input, ctx, ctx_mask, dec_mask)
        assert jnp.allclose(out['dec_output'], ref['dec_output'],
                            atol=1e-4, rtol=1e-4)
        assert jnp.allclose(out['att_output']['expected_ctx'],
                            ref['att_output']['expected_ctx'], atol=1e-4, rtol=1e-4)
        assert jnp.allclose(out['att_output']['p_ctx'],
                            ref['att_output']['p_ctx'], atol=1e-4, rtol=1e-4)

    print("KERNEL_OK")
</pallas_src>

<mosaic_0001>
module attributes {stable_mosaic.version = 11 : i64} {
  func.func @_fused_decoder_kernel(%arg0: memref<8x128xf32, #tpu.memory_space<vmem>>, %arg1: memref<8x128xf32, #tpu.memory_space<vmem>>, %arg2: memref<8x8x128xf32, #tpu.memory_space<vmem>>, %arg3: memref<8x8xf32, #tpu.memory_space<vmem>>, %arg4: memref<8x1xf32, #tpu.memory_space<vmem>>, %arg5: memref<8x128xf32, #tpu.memory_space<vmem>>, %arg6: memref<8x128xf32, #tpu.memory_space<vmem>>, %arg7: memref<8x128xf32, #tpu.memory_space<vmem>>, %arg8: memref<8x128xf32, #tpu.memory_space<vmem>>, %arg9: memref<128x512xf32, #tpu.memory_space<vmem>>, %arg10: memref<128x512xf32, #tpu.memory_space<vmem>>, %arg11: memref<128x512xf32, #tpu.memory_space<vmem>>, %arg12: memref<1x512xf32, #tpu.memory_space<vmem>>, %arg13: memref<128x512xf32, #tpu.memory_space<vmem>>, %arg14: memref<128x512xf32, #tpu.memory_space<vmem>>, %arg15: memref<1x512xf32, #tpu.memory_space<vmem>>, %arg16: memref<128x128xf32, #tpu.memory_space<vmem>>, %arg17: memref<128x128xf32, #tpu.memory_space<vmem>>, %arg18: memref<128x128xf32, #tpu.memory_space<vmem>>, %arg19: memref<1x128xf32, #tpu.memory_space<vmem>>, %arg20: memref<128x128xf32, #tpu.memory_space<vmem>>, %arg21: memref<1x128xf32, #tpu.memory_space<vmem>>, %arg22: memref<128x128xf32, #tpu.memory_space<vmem>>, %arg23: memref<1x128xf32, #tpu.memory_space<vmem>>, %arg24: memref<8x128xf32, #tpu.memory_space<vmem>>, %arg25: memref<8x128xf32, #tpu.memory_space<vmem>>, %arg26: memref<8x8xf32, #tpu.memory_space<vmem>>, %arg27: memref<8x128xf32, #tpu.memory_space<vmem>>, %arg28: memref<8x128xf32, #tpu.memory_space<vmem>>, %arg29: memref<8x128xf32, #tpu.memory_space<vmem>>, %arg30: memref<8x128xf32, #tpu.memory_space<vmem>>, %arg31: memref<8x128xf32, #tpu.memory_space<vmem>>) attributes {dimension_semantics = [], scalar_prefetch = 0 : i64, scratch_operands = 0 : i64, tpu.core_type = #tpu.core_type<tc>} {
    %c0 = arith.constant 0 : index
    %c0_0 = arith.constant 0 : index
    %0 = vector.load %arg4[%c0, %c0_0] : memref<8x1xf32, #tpu.memory_space<vmem>>, vector<8x1xf32>
    %c0_1 = arith.constant 0 : index
    %c0_2 = arith.constant 0 : index
    %1 = vector.load %arg0[%c0_1, %c0_2] : memref<8x128xf32, #tpu.memory_space<vmem>>, vector<8x128xf32>
    %c0_3 = arith.constant 0 : index
    %c0_4 = arith.constant 0 : index
    %2 = vector.load %arg5[%c0_3, %c0_4] : memref<8x128xf32, #tpu.memory_space<vmem>>, vector<8x128xf32>
    %c0_5 = arith.constant 0 : index
    %c0_6 = arith.constant 0 : index
    %3 = vector.load %arg6[%c0_5, %c0_6] : memref<8x128xf32, #tpu.memory_space<vmem>>, vector<8x128xf32>
    %c0_7 = arith.constant 0 : index
    %c0_8 = arith.constant 0 : index
    %4 = vector.load %arg9[%c0_7, %c0_8] : memref<128x512xf32, #tpu.memory_space<vmem>>, vector<128x512xf32>
    %cst = arith.constant dense<0.000000e+00> : vector<8x512xf32>
    %5 = tpu.matmul %1, %4, %cst {dimension_numbers = #tpu.dot_dimension_numbers<[1], [0], [0], [1], [0, 0, 1, 1], [], []>} : vector<8x128xf32>, vector<128x512xf32>, vector<8x512xf32> -> vector<8x512xf32>
    %c0_9 = arith.constant 0 : index
    %c0_10 = arith.constant 0 : index
    %6 = vector.load %arg1[%c0_9, %c0_10] : memref<8x128xf32, #tpu.memory_space<vmem>>, vector<8x128xf32>
    %c0_11 = arith.constant 0 : index
    %c0_12 = arith.constant 0 : index
    %7 = vector.load %arg10[%c0_11, %c0_12] : memref<128x512xf32, #tpu.memory_space<vmem>>, vector<128x512xf32>
    %cst_13 = arith.constant dense<0.000000e+00> : vector<8x512xf32>
    %8 = tpu.matmul %6, %7, %cst_13 {dimension_numbers = #tpu.dot_dimension_numbers<[1], [0], [0], [1], [0, 0, 1, 1], [], []>} : vector<8x128xf32>, vector<128x512xf32>, vector<8x512xf32> -> vector<8x512xf32>
    %9 = arith.addf %5, %8 : vector<8x512xf32>
    %c0_14 = arith.constant 0 : index
    %c0_15 = arith.constant 0 : index
    %10 = vector.load %arg11[%c0_14, %c0_15] : memref<128x512xf32, #tpu.memory_space<vmem>>, vector<128x512xf32>
    %cst_16 = arith.constant dense<0.000000e+00> : vector<8x512xf32>
    %11 = tpu.matmul %2, %10, %cst_16 {dimension_numbers = #tpu.dot_dimension_numbers<[1], [0], [0], [1], [0, 0, 1, 1], [], []>} : vector<8x128xf32>, vector<128x512xf32>, vector<8x512xf32> -> vector<8x512xf32>
    %12 = arith.addf %9, %11 : vector<8x512xf32>
    %c0_17 = arith.constant 0 : index
    %c0_18 = arith.constant 0 : index
    %13 = vector.load %arg12[%c0_17, %c0_18] : memref<1x512xf32, #tpu.memory_space<vmem>>, vector<1x512xf32>
    %14 = vector.broadcast %13 : vector<1x512xf32> to vector<8x512xf32>
    %15 = arith.addf %12, %14 : vector<8x512xf32>
    %16 = vector.extract_strided_slice %15 {offsets = [0, 0], sizes = [8, 128], strides = [1, 1]} : vector<8x512xf32> to vector<8x128xf32>
    %17 = arith.negf %16 : vector<8x128xf32>
    %18 = math.exp %17 : vector<8x128xf32>
    %cst_19 = arith.constant 1.000000e+00 : f32
    %19 = vector.broadcast %cst_19 : f32 to vector<8x128xf32>
    %20 = arith.addf %19, %18 : vector<8x128xf32>
    %21 = arith.divf %19, %20 : vector<8x128xf32>
    %22 = vector.extract_strided_slice %15 {offsets = [0, 128], sizes = [8, 128], strides = [1, 1]} : vector<8x512xf32> to vector<8x128xf32>
    %23 = arith.negf %22 : vector<8x128xf32>
    %24 = math.exp %23 : vector<8x128xf32>
    %cst_20 = arith.constant 1.000000e+00 : f32
    %25 = vector.broadcast %cst_20 : f32 to vector<8x128xf32>
    %26 = arith.addf %25, %24 : vector<8x128xf32>
    %27 = arith.divf %25, %26 : vector<8x128xf32>
    %28 = vector.extract_strided_slice %15 {offsets = [0, 256], sizes = [8, 128], strides = [1, 1]} : vector<8x512xf32> to vector<8x128xf32>
    %29 = math.tanh %28 : vector<8x128xf32>
    %30 = vector.extract_strided_slice %15 {offsets = [0, 384], sizes = [8, 128], strides = [1, 1]} : vector<8x512xf32> to vector<8x128xf32>
    %31 = arith.negf %30 : vector<8x128xf32>
    %32 = math.exp %31 : vector<8x128xf32>
    %cst_21 = arith.constant 1.000000e+00 : f32
    %33 = vector.broadcast %cst_21 : f32 to vector<8x128xf32>
    %34 = arith.addf %33, %32 : vector<8x128xf32>
    %35 = arith.divf %33, %34 : vector<8x128xf32>
    %36 = arith.mulf %27, %3 : vector<8x128xf32>
    %37 = arith.mulf %21, %29 : vector<8x128xf32>
    %38 = arith.addf %36, %37 : vector<8x128xf32>
    %39 = math.tanh %38 : vector<8x128xf32>
    %40 = arith.mulf %35, %39 : vector<8x128xf32>
    %c0_22 = arith.constant 0 : index
    %c0_23 = arith.constant 0 : index
    %41 = vector.load %arg28[%c0_22, %c0_23] : memref<8x128xf32, #tpu.memory_space<vmem>>, vector<8x128xf32>
    tpu.vector_store %arg28[%c0_22, %c0_23], %40 {strides = array<i32>} : memref<8x128xf32, #tpu.memory_space<vmem>>, vector<8x128xf32>,
    %c0_24 = arith.constant 0 : index
    %c0_25 = arith.constant 0 : index
    %42 = vector.load %arg29[%c0_24, %c0_25] : memref<8x128xf32, #tpu.memory_space<vmem>>, vector<8x128xf32>
    tpu.vector_store %arg29[%c0_24, %c0_25], %38 {strides = array<i32>} : memref<8x128xf32, #tpu.memory_space<vmem>>, vector<8x128xf32>,
    %43 = vector.broadcast %0 : vector<8x1xf32> to vector<8x128xf32>
    %44 = arith.mulf %40, %43 : vector<8x128xf32>
    %c0_26 = arith.constant 0 : index
    %c0_27 = arith.constant 0 : index
    %45 = vector.load %arg7[%c0_26, %c0_27] : memref<8x128xf32, #tpu.memory_space<vmem>>, vector<8x128xf32>
    %c0_28 = arith.constant 0 : index
    %c0_29 = arith.constant 0 : index
    %46 = vector.load %arg8[%c0_28, %c0_29] : memref<8x128xf32, #tpu.memory_space<vmem>>, vector<8x128xf32>
    %c0_30 = arith.constant 0 : index
    %c0_31 = arith.constant 0 : index
    %47 = vector.load %arg13[%c0_30, %c0_31] : memref<128x512xf32, #tpu.memory_space<vmem>>, vector<128x512xf32>
    %cst_32 = arith.constant dense<0.000000e+00> : vector<8x512xf32>
    %48 = tpu.matmul %44, %47, %cst_32 {dimension_numbers = #tpu.dot_dimension_numbers<[1], [0], [0], [1], [0, 0, 1, 1], [], []>} : vector<8x128xf32>, vector<128x512xf32>, vector<8x512xf32> -> vector<8x512xf32>
    %c0_33 = arith.constant 0 : index
    %c0_34 = arith.constant 0 : index
    %49 = vector.load %arg14[%c0_33, %c0_34] : memref<128x512xf32, #tpu.memory_space<vmem>>, vector<128x512xf32>
    %cst_35 = arith.constant dense<0.000000e+00> : vector<8x512xf32>
    %50 = tpu.matmul %45, %49, %cst_35 {dimension_numbers = #tpu.dot_dimension_numbers<[1], [0], [0], [1], [0, 0, 1, 1], [], []>} : vector<8x128xf32>, vector<128x512xf32>, vector<8x512xf32> -> vector<8x512xf32>
    %51 = arith.addf %48, %50 : vector<8x512xf32>
    %c0_36 = arith.constant 0 : index
    %c0_37 = arith.constant 0 : index
    %52 = vector.load %arg15[%c0_36, %c0_37] : memref<1x512xf32, #tpu.memory_space<vmem>>, vector<1x512xf32>
    %53 = vector.broadcast %52 : vector<1x512xf32> to vector<8x512xf32>
    %54 = arith.addf %51, %53 : vector<8x512xf32>
    %55 = vector.extract_strided_slice %54 {offsets = [0, 0], sizes = [8, 128], strides = [1, 1]} : vector<8x512xf32> to vector<8x128xf32>
    %56 = arith.negf %55 : vector<8x128xf32>
    %57 = math.exp %56 : vector<8x128xf32>
    %cst_38 = arith.constant 1.000000e+00 : f32
    %58 = vector.broadcast %cst_38 : f32 to vector<8x128xf32>
    %59 = arith.addf %58, %57 : vector<8x128xf32>
    %60 = arith.divf %58, %59 : vector<8x128xf32>
    %61 = vector.extract_strided_slice %54 {offsets = [0, 128], sizes = [8, 128], strides = [1, 1]} : vector<8x512xf32> to vector<8x128xf32>
    %62 = arith.negf %61 : vector<8x128xf32>
    %63 = math.exp %62 : vector<8x128xf32>
    %cst_39 = arith.constant 1.000000e+00 : f32
    %64 = vector.broadcast %cst_39 : f32 to vector<8x128xf32>
    %65 = arith.addf %64, %63 : vector<8x128xf32>
    %66 = arith.divf %64, %65 : vector<8x128xf32>
    %67 = vector.extract_strided_slice %54 {offsets = [0, 256], sizes = [8, 128], strides = [1, 1]} : vector<8x512xf32> to vector<8x128xf32>
    %68 = math.tanh %67 : vector<8x128xf32>
    %69 = vector.extract_strided_slice %54 {offsets = [0, 384], sizes = [8, 128], strides = [1, 1]} : vector<8x512xf32> to vector<8x128xf32>
    %70 = arith.negf %69 : vector<8x128xf32>
    %71 = math.exp %70 : vector<8x128xf32>
    %cst_40 = arith.constant 1.000000e+00 : f32
    %72 = vector.broadcast %cst_40 : f32 to vector<8x128xf32>
    %73 = arith.addf %72, %71 : vector<8x128xf32>
    %74 = arith.divf %72, %73 : vector<8x128xf32>
    %75 = arith.mulf %66, %46 : vector<8x128xf32>
    %76 = arith.mulf %60, %68 : vector<8x128xf32>
    %77 = arith.addf %75, %76 : vector<8x128xf32>
    %78 = math.tanh %77 : vector<8x128xf32>
    %79 = arith.mulf %74, %78 : vector<8x128xf32>
    %c0_41 = arith.constant 0 : index
    %c0_42 = arith.constant 0 : index
    %80 = vector.load %arg30[%c0_41, %c0_42] : memref<8x128xf32, #tpu.memory_space<vmem>>, vector<8x128xf32>
    tpu.vector_store %arg30[%c0_41, %c0_42], %79 {strides = array<i32>} : memref<8x128xf32, #tpu.memory_space<vmem>>, vector<8x128xf32>,
    %c0_43 = arith.constant 0 : index
    %c0_44 = arith.constant 0 : index
    %81 = vector.load %arg31[%c0_43, %c0_44] : memref<8x128xf32, #tpu.memory_space<vmem>>, vector<8x128xf32>
    tpu.vector_store %arg31[%c0_43, %c0_44], %77 {strides = array<i32>} : memref<8x128xf32, #tpu.memory_space<vmem>>, vector<8x128xf32>,
    %82 = vector.broadcast %0 : vector<8x1xf32> to vector<8x128xf32>
    %83 = arith.mulf %79, %82 : vector<8x128xf32>
    %c0_45 = arith.constant 0 : index
    %c0_46 = arith.constant 0 : index
    %c0_47 = arith.constant 0 : index
    %84 = vector.load %arg2[%c0_45, %c0_46, %c0_47] : memref<8x8x128xf32, #tpu.memory_space<vmem>>, vector<8x8x128xf32>
    %c0_48 = arith.constant 0 : index
    %c0_49 = arith.constant 0 : index
    %85 = vector.load %arg3[%c0_48, %c0_49] : memref<8x8xf32, #tpu.memory_space<vmem>>, vector<8x8xf32>
    %c0_50 = arith.constant 0 : index
    %c0_51 = arith.constant 0 : index
    %86 = vector.load %arg16[%c0_50, %c0_51] : memref<128x128xf32, #tpu.memory_space<vmem>>, vector<128x128xf32>
    %cst_52 = arith.constant dense<0.000000e+00> : vector<8x128xf32>
    %87 = tpu.matmul %83, %86, %cst_52 {dimension_numbers = #tpu.dot_dimension_numbers<[1], [0], [0], [1], [0, 0, 1, 1], [], []>} : vector<8x128xf32>, vector<128x128xf32>, vector<8x128xf32> -> vector<8x128xf32>
    %88 = vector.shape_cast %87 : vector<8x128xf32> to vector<8x1x128xf32>
    "tpu.trace_start"() <{level = 10 : i32, message = "bqc,btc->bqt"}> : () -> ()
    %cst_53 = arith.constant dense<0.000000e+00> : vector<8x1x8xf32>
    %89 = tpu.matmul %88, %84, %cst_53 {dimension_numbers = #tpu.dot_dimension_numbers<[2], [2], [1], [1], [0, 0, 0, 1, 1, 1], [0], [0]>} : vector<8x1x128xf32>, vector<8x8x128xf32>, vector<8x1x8xf32> -> vector<8x1x8xf32>
    "tpu.trace_stop"() : () -> ()
    %90 = vector.shape_cast %89 : vector<8x1x8xf32> to vector<8x8xf32>
    %cst_54 = arith.constant 0.000000e+00 : f32
    %91 = vector.broadcast %cst_54 : f32 to vector<8x8xf32>
    %92 = arith.cmpf ogt, %85, %91 : vector<8x8xf32>
    %cst_55 = arith.constant -1.000000e+30 : f32
    %93 = vector.broadcast %cst_55 : f32 to vector<8x8xf32>
    %94 = arith.select %92, %90, %93 : vector<8x8xi1>, vector<8x8xf32>
    %cst_56 = arith.constant dense<0xFF800000> : vector<8xf32>
    %95 = vector.multi_reduction <maximumf>, %94, %cst_56 [1] : vector<8x8xf32> to vector<8xf32>
    %96 = vector.shape_cast %95 : vector<8xf32> to vector<8x1xf32>
    %97 = vector.broadcast %96 : vector<8x1xf32> to vector<8x8xf32>
    %98 = arith.subf %94, %97 : vector<8x8xf32>
    %99 = math.exp %98 : vector<8x8xf32>
    %100 = arith.mulf %99, %85 : vector<8x8xf32>
    %cst_57 = arith.constant dense<0.000000e+00> : vector<8xf32>
    %101 = vector.multi_reduction <add>, %100, %cst_57 [1] : vector<8x8xf32> to vector<8xf32>
    %102 = vector.shape_cast %101 : vector<8xf32> to vector<8x1xf32>
    %cst_58 = arith.constant 1.000000e-30 : f32
    %103 = vector.broadcast %cst_58 : f32 to vector<8x1xf32>
    %104 = arith.maximumf %102, %103 : vector<8x1xf32>
    %105 = vector.broadcast %104 : vector<8x1xf32> to vector<8x8xf32>
    %106 = arith.divf %100, %105 : vector<8x8xf32>
    %107 = vector.shape_cast %106 : vector<8x8xf32> to vector<8x1x8xf32>
    "tpu.trace_start"() <{level = 10 : i32, message = "bqt,btc->bqc"}> : () -> ()
    %cst_59 = arith.constant dense<0.000000e+00> : vector<8x1x128xf32>
    %108 = tpu.matmul %107, %84, %cst_59 {dimension_numbers = #tpu.dot_dimension_numbers<[2], [1], [1], [2], [0, 0, 0, 1, 1, 2], [0], [0]>} : vector<8x1x8xf32>, vector<8x8x128xf32>, vector<8x1x128xf32> -> vector<8x1x128xf32>
    "tpu.trace_stop"() : () -> ()
    %109 = vector.shape_cast %108 : vector<8x1x128xf32> to vector<8x128xf32>
    %c0_60 = arith.constant 0 : index
    %c0_61 = arith.constant 0 : index
    %110 = vector.load %arg25[%c0_60, %c0_61] : memref<8x128xf32, #tpu.memory_space<vmem>>, vector<8x128xf32>
    tpu.vector_store %arg25[%c0_60, %c0_61], %109 {strides = array<i32>} : memref<8x128xf32, #tpu.memory_space<vmem>>, vector<8x128xf32>,
    %c0_62 = arith.constant 0 : index
    %c0_63 = arith.constant 0 : index
    %111 = vector.load %arg26[%c0_62, %c0_63] : memref<8x8xf32, #tpu.memory_space<vmem>>, vector<8x8xf32>
    tpu.vector_store %arg26[%c0_62, %c0_63], %106 {strides = array<i32>} : memref<8x8xf32, #tpu.memory_space<vmem>>, vector<8x8xf32>,
    %c0_64 = arith.constant 0 : index
    %c0_65 = arith.constant 0 : index
    %112 = vector.load %arg17[%c0_64, %c0_65] : memref<128x128xf32, #tpu.memory_space<vmem>>, vector<128x128xf32>
    %cst_66 = arith.constant dense<0.000000e+00> : vector<8x128xf32>
    %113 = tpu.matmul %109, %112, %cst_66 {dimension_numbers = #tpu.dot_dimension_numbers<[1], [0], [0], [1], [0, 0, 1, 1], [], []>} : vector<8x128xf32>, vector<128x128xf32>, vector<8x128xf32> -> vector<8x128xf32>
    %c0_67 = arith.constant 0 : index
    %c0_68 = arith.constant 0 : index
    %114 = vector.load %arg18[%c0_67, %c0_68] : memref<128x128xf32, #tpu.memory_space<vmem>>, vector<128x128xf32>
    %cst_69 = arith.constant dense<0.000000e+00> : vector<8x128xf32>
    %115 = tpu.matmul %83, %114, %cst_69 {dimension_numbers = #tpu.dot_dimension_numbers<[1], [0], [0], [1], [0, 0, 1, 1], [], []>} : vector<8x128xf32>, vector<128x128xf32>, vector<8x128xf32> -> vector<8x128xf32>
    %116 = arith.addf %113, %115 : vector<8x128xf32>
    %c0_70 = arith.constant 0 : index
    %c0_71 = arith.constant 0 : index
    %117 = vector.load %arg19[%c0_70, %c0_71] : memref<1x128xf32, #tpu.memory_space<vmem>>, vector<1x128xf32>
    %118 = vector.broadcast %117 : vector<1x128xf32> to vector<8x128xf32>
    %119 = arith.addf %116, %118 : vector<8x128xf32>
    %120 = arith.negf %119 : vector<8x128xf32>
    %121 = math.exp %120 : vector<8x128xf32>
    %cst_72 = arith.constant 1.000000e+00 : f32
    %122 = vector.broadcast %cst_72 : f32 to vector<8x128xf32>
    %123 = arith.addf %122, %121 : vector<8x128xf32>
    %124 = arith.divf %122, %123 : vector<8x128xf32>
    %c0_73 = arith.constant 0 : index
    %c0_74 = arith.constant 0 : index
    %125 = vector.load %arg20[%c0_73, %c0_74] : memref<128x128xf32, #tpu.memory_space<vmem>>, vector<128x128xf32>
    %cst_75 = arith.constant dense<0.000000e+00> : vector<8x128xf32>
    %126 = tpu.matmul %109, %125, %cst_75 {dimension_numbers = #tpu.dot_dimension_numbers<[1], [0], [0], [1], [0, 0, 1, 1], [], []>} : vector<8x128xf32>, vector<128x128xf32>, vector<8x128xf32> -> vector<8x128xf32>
    %c0_76 = arith.constant 0 : index
    %c0_77 = arith.constant 0 : index
    %127 = vector.load %arg21[%c0_76, %c0_77] : memref<1x128xf32, #tpu.memory_space<vmem>>, vector<1x128xf32>
    %128 = vector.broadcast %127 : vector<1x128xf32> to vector<8x128xf32>
    %129 = arith.addf %126, %128 : vector<8x128xf32>
    %c0_78 = arith.constant 0 : index
    %c0_79 = arith.constant 0 : index
    %130 = vector.load %arg22[%c0_78, %c0_79] : memref<128x128xf32, #tpu.memory_space<vmem>>, vector<128x128xf32>
    %cst_80 = arith.constant dense<0.000000e+00> : vector<8x128xf32>
    %131 = tpu.matmul %83, %130, %cst_80 {dimension_numbers = #tpu.dot_dimension_numbers<[1], [0], [0], [1], [0, 0, 1, 1], [], []>} : vector<8x128xf32>, vector<128x128xf32>, vector<8x128xf32> -> vector<8x128xf32>
    %c0_81 = arith.constant 0 : index
    %c0_82 = arith.constant 0 : index
    %132 = vector.load %arg23[%c0_81, %c0_82] : memref<1x128xf32, #tpu.memory_space<vmem>>, vector<1x128xf32>
    %133 = vector.broadcast %132 : vector<1x128xf32> to vector<8x128xf32>
    %134 = arith.addf %131, %133 : vector<8x128xf32>
    %135 = arith.mulf %124, %129 : vector<8x128xf32>
    %cst_83 = arith.constant 1.000000e+00 : f32
    %136 = vector.broadcast %cst_83 : f32 to vector<8x128xf32>
    %137 = arith.subf %136, %124 : vector<8x128xf32>
    %138 = arith.mulf %137, %134 : vector<8x128xf32>
    %139 = arith.addf %135, %138 : vector<8x128xf32>
    %140 = math.tanh %139 : vector<8x128xf32>
    %141 = vector.broadcast %0 : vector<8x1xf32> to vector<8x128xf32>
    %142 = arith.mulf %140, %141 : vector<8x128xf32>
    %c0_84 = arith.constant 0 : index
    %c0_85 = arith.constant 0 : index
    %143 = vector.load %arg27[%c0_84, %c0_85] : memref<8x128xf32, #tpu.memory_space<vmem>>, vector<8x128xf32>
    tpu.vector_store %arg27[%c0_84, %c0_85], %142 {strides = array<i32>} : memref<8x128xf32, #tpu.memory_space<vmem>>, vector<8x128xf32>,
    %c0_86 = arith.constant 0 : index
    %c0_87 = arith.constant 0 : index
    %144 = vector.load %arg24[%c0_86, %c0_87] : memref<8x128xf32, #tpu.memory_space<vmem>>, vector<8x128xf32>
    tpu.vector_store %arg24[%c0_86, %c0_87], %142 {strides = array<i32>} : memref<8x128xf32, #tpu.memory_space<vmem>>, vector<8x128xf32>,
    return
  }
}

</mosaic_0001>

<bundles_post_ra>
// kernel: tpu_custom_call.1
= control target key start
LH: loop header
LB: loop body
LE: loop exit
PB: predicated region body
PF: predicated region fallthrough
CT: control target
= control target key end

     0   :  { %s4424_s6 = smov 1   ;;  %s4425_s10 = smov 2   ;;  %s4964_s0 = inlined_call_operand.smem [shape: u32[32], index: -1, kind: input, shape index: {}] }
   0x1   :  { %s4495_s5 = sld [smem:[%s4964_s0]]   ;;  %s4426_s14 = smov 3  }
   0x2   :  { %s4500_s9 = sld [smem:[%s4964_s0 + %s4424_s6]]   ;;  %s4427_s18 = smov 4  }
   0x3   :  { %s4505_s13 = sld [smem:[%s4964_s0 + %s4425_s10]]   ;;  %s4428_s22 = smov 5  }
   0x4   :  { %s4510_s17 = sld [smem:[%s4964_s0 + %s4426_s14]]   ;;  %s4429_s26 = smov 6  }
   0x5   :  { %s4515_s21 = sld [smem:[%s4964_s0 + %s4427_s18]]   ;;  %s4430_s30 = smov 7  }
   0x6   :  { %s4520_s25 = sld [smem:[%s4964_s0 + %s4428_s22]]   ;;  %s4431_s4 = smov 8  }
   0x7   :  { %4965 = sst [smem:[#allocation54_spill]] %s4495_s5  ;;  %s4432_s10 = smov 9  }
   0x8   :  { %s4525_s29 = sld [smem:[%s4964_s0 + %s4429_s26]]   ;;  %s4433_s15 = smov 10  }
   0x9   :  { %s4530_s3 = sld [smem:[%s4964_s0 + %s4430_s30]]   ;;  %s4434_s20 = smov 11  }
   0xa   :  { %s4535_s8 = sld [smem:[%s4964_s0 + %s4431_s4]]   ;;  %s4435_s26 = smov 12  }
   0xb   :  { %4966 = sst [smem:[#allocation55_spill]] %s4515_s21  ;;  %s4436_s1 = smov 13  }
   0xc   :  { %4967 = sst [smem:[#allocation56_spill]] %s4520_s25  ;;  %s4437_s7 = smov 14  }
   0xd   :  { %s4540_s14 = sld [smem:[%s4964_s0 + %s4432_s10]]   ;;  %s4439_s22 = smov 16  }
   0xe   :  { %s4545_s19 = sld [smem:[%s4964_s0 + %s4433_s15]]   ;;  %s4438_s15 = smov 15  }
   0xf   :  { %s4550_s24 = sld [smem:[%s4964_s0 + %s4434_s20]]   ;;  %s4440_s28 = smov 17  }
  0x10   :  { %s4555_s30 = sld [smem:[%s4964_s0 + %s4435_s26]]  }
  0x11   :  { %s4560_s6 = sld [smem:[%s4964_s0 + %s4436_s1]]  }
  0x12   :  { %s4565_s12 = sld [smem:[%s4964_s0 + %s4437_s7]]   ;;  %s4441_s7 = smov 18  }
  0x13   :  { %s4570_s20 = sld [smem:[%s4964_s0 + %s4438_s15]]   ;;  %s4442_s15 = smov 19  }
  0x14   :  { %s4575_s27 = sld [smem:[%s4964_s0 + %s4439_s22]]   ;;  %s4443_s22 = smov 20  }
  0x15   :  { %s4580_s4 = sld [smem:[%s4964_s0 + %s4440_s28]]   ;;  %s4444_s28 = smov 21  }
  0x16   :  { %4968 = sst [smem:[#allocation57_spill]] %s4555_s30 }
  0x17   :  { %s4585_s30 = sld [smem:[%s4964_s0 + %s4441_s7]]   ;;  %s4445_s7 = smov 22  }
  0x18   :  { %s4595_s21 = sld [smem:[%s4964_s0 + %s4443_s22]]   ;;  %s4447_s22 = smov 24  }
  0x19   :  { %4969 = sst [smem:[#allocation58_spill]] %s4570_s20 }
  0x1a   :  { %s4590_s20 = sld [smem:[%s4964_s0 + %s4442_s15]]   ;;  %s4446_s15 = smov 23  }
  0x1b   :  { %s4600_s25 = sld [smem:[%s4964_s0 + %s4444_s28]]   ;;  %s4448_s28 = smov 25  }
  0x1c   :  { %s4605_s5 = sld [smem:[%s4964_s0 + %s4445_s7]]   ;;  %s4449_s7 = smov 26  }
  0x1e   :  { %4971 = sst [smem:[#allocation60_spill]] %s4595_s21 }
  0x1f   :  { %s4615_s21 = sld [smem:[%s4964_s0 + %s4447_s22]]   ;;  %s4451_s22 = smov 28  }
  0x20   :  { %4970 = sst [smem:[#allocation59_spill]] %s4590_s20 }
  0x21   :  { %4972 = sst [smem:[#allocation61_spill]] %s4600_s25 }
  0x22   :  { %4973 = sst [smem:[#allocation62_spill]] %s4605_s5 }
  0x23   :  { %s4610_s20 = sld [smem:[%s4964_s0 + %s4446_s15]]   ;;  %s4450_s15 = smov 27  }
  0x24   :  { %s4620_s25 = sld [smem:[%s4964_s0 + %s4448_s28]]   ;;  %s4452_s28 = smov 29  }
  0x25   :  { %4975 = sst [smem:[#allocation64_spill]] %s4615_s21 }
  0x26   :  { %s4625_s5 = sld [smem:[%s4964_s0 + %s4449_s7]]   ;;  %s4453_s7 = smov 30  }
  0x27   :  { %s4635_s21 = sld [smem:[%s4964_s0 + %s4451_s22]]  }
  0x29   :  { %4974 = sst [smem:[#allocation63_spill]] %s4610_s20 }
  0x2a   :  { %4976 = sst [smem:[#allocation65_spill]] %s4620_s25 }
  0x2b   :  { %s4630_s20 = sld [smem:[%s4964_s0 + %s4450_s15]]   ;;  %s4454_s15 = smov 31  }
  0x2c   :  { %4977 = sst [smem:[#allocation66_spill]] %s4625_s5 }
  0x2d   :  { %s4640_s25 = sld [smem:[%s4964_s0 + %s4452_s28]]  }
  0x2e   :  { %s4645_s5 = sld [smem:[%s4964_s0 + %s4453_s7]]  }
  0x31   :  { %4978 = sst [smem:[#allocation67_spill]] %s4630_s20 }
  0x32   :  { %s4650_s20 = sld [smem:[%s4964_s0 + %s4454_s15]]  }
  0x33   :  { %69 = vsyncpa [#allocation3], 0 }
  0x34   :  { %70 = vsyncpa [#allocation6], 0 }
  0x35   :  { %71 = vsyncpa [#allocation9], 0 }
  0x36   :  { %72 = vsyncpa [#allocation12], 0 }
  0x37   :  { %73 = vsyncpa [#allocation15], 0 }
  0x38   :  { %74 = vsyncpa [#allocation18], 0 }
  0x39   :  { %75 = vsyncpa [#allocation21], 0 }
  0x3a   :  { %76 = vsyncpa [#allocation24], 0 }
  0x3b   :  { %77 = vsyncpa [#allocation27], 0 }
  0x3c   :  { %78 = vsyncpa [#allocation4], 0 }
  0x3d   :  { %79 = vsyncpa [#allocation30], 0 }
  0x3e   :  { %80 = vsyncpa [#allocation33], 0 }
  0x3f   :  { %81 = vsyncpa [#allocation36], 0 }
  0x40   :  { %82 = vsyncpa [#allocation39], 0  ;;  %s4455_s22 = smov [#allocation5]  }
  0x41   :  { %s100_s23 = sshll.u32 %s4455_s22, 4  ;;  %s101_s23 = int_to_ptr.vmem [resolvable:$true] %s100_s23 }
  0x42   :  { %s3924_s26 = scalar_lea.vmem %s101_s23, 1024  ;;  %p3929_p1 = scmp.lt.s32.totalorder %s101_s23, %s101_s23 }
  0x43   :  { %p3925_p0 = scmp.ne.s32.totalorder %s101_s23, %s3924_s26  ;;  %p3930_p2 = scmp.lt.s32.totalorder %s3924_s26, %s3924_s26 }
  0x45   :  { %p3931_p3 = por %p3930_p2, %p3929_p1 }
  0x47   :  { %p3932_p4 = pnand %p3931_p3, %p3925_p0 }
  0x49   :  { %3935 = shalt.err (!%p3932_p4)
}
  0x4a   :  { %s4456_s0 = smov 128   ;;  %s4457_s28 = smov 8  }
  0x4b   :  { %106 = dma.hbm_to_vmem [thread:$0]  %s4505_s13, 1024, %s101_s23, [#allocation6], %s4456_s0, %s4456_s0, %s4457_s28  }
  0x4c   :  { %s4458_s1 = smov [#allocation8]   ;;  %s4459_s7 = smov [#allocation11]  }
  0x4d   :  { %s127_s2 = sshll.u32 %s4458_s1, 4  ;;  %s147_s10 = sshll.u32 %s4459_s7, 4  ;;  %s128_s2 = int_to_ptr.vmem [resolvable:$true] %s127_s2  ;;  %s148_s10 = int_to_ptr.vmem [resolvable:$true] %s147_s10 }
  0x4e   :  { %s3944_s11 = scalar_lea.vmem %s128_s2, 128  ;;  %p3949_p6 = scmp.lt.s32.totalorder %s128_s2, %s128_s2 }
  0x4f   :  { %p3945_p5 = scmp.ne.s32.totalorder %s128_s2, %s3944_s11  ;;  %p3950_p7 = scmp.lt.s32.totalorder %s3944_s11, %s3944_s11 }
  0x51   :  { %p3951_p8 = por %p3950_p7, %p3949_p6 }
  0x53   :  { %p3952_p9 = pnand %p3951_p8, %p3945_p5 }
  0x55   :  { %3955 = shalt.err (!%p3952_p9)
}
  0x56   :  { %130 = dma.hbm_to_vmem [thread:$0]  %s4525_s29, 128, %s128_s2, [#allocation9]  }
  0x57   :  { %s3964_s15 = scalar_lea.vmem %s148_s10, 128  ;;  %p3969_p11 = scmp.lt.s32.totalorder %s148_s10, %s148_s10 }
  0x58   :  { %p3965_p10 = scmp.ne.s32.totalorder %s148_s10, %s3964_s15  ;;  %p3970_p12 = scmp.lt.s32.totalorder %s3964_s15, %s3964_s15 }
  0x5a   :  { %p3971_p13 = por %p3970_p12, %p3969_p11 }
  0x5c   :  { %p3972_p0 = pnand %p3971_p13, %p3965_p10 }
  0x5e   :  { %3975 = shalt.err (!%p3972_p0)
}
  0x5f   :  { %150 = dma.hbm_to_vmem [thread:$0]  %s4535_s8, 128, %s148_s10, [#allocation12]  }
  0x60   :  { %s4460_s13 = smov [#allocation14]   ;;  %s4461_s18 = smov [#allocation17]  }
  0x61   :  { %s168_s16 = sshll.u32 %s4460_s13, 4  ;;  %s194_s22 = sshll.u32 %s4461_s18, 4  ;;  %s169_s16 = int_to_ptr.vmem [resolvable:$true] %s168_s16  ;;  %s195_s22 = int_to_ptr.vmem [resolvable:$true] %s194_s22 }
  0x62   :  { %s3984_s23 = scalar_lea.vmem %s169_s16, 8192  ;;  %p3989_p2 = scmp.lt.s32.totalorder %s169_s16, %s169_s16 }
  0x63   :  { %p3985_p1 = scmp.ne.s32.totalorder %s169_s16, %s3984_s23  ;;  %p3990_p3 = scmp.lt.s32.totalorder %s3984_s23, %s3984_s23 }
  0x65   :  { %p3991_p4 = por %p3990_p3, %p3989_p2 }
  0x67   :  { %p3992_p5 = pnand %p3991_p4, %p3985_p1 }
  0x69   :  { %3995 = shalt.err (!%p3992_p5)
}
  0x6a   :  { %s4462_s29 = smov 512   ;;  %s4463_s26 = smov 32  }
  0x6b   :  { %174 = dma.hbm_to_vmem [thread:$0]  %s4545_s19, 8192, %s169_s16, [#allocation15], %s4462_s29, %s4462_s29, %s4463_s26  }
  0x6c   :  { %s4004_s8 = scalar_lea.vmem %s195_s22, 8192  ;;  %p4009_p7 = scmp.lt.s32.totalorder %s195_s22, %s195_s22 }
  0x6d   :  { %p4005_p6 = scmp.ne.s32.totalorder %s195_s22, %s4004_s8  ;;  %p4010_p8 = scmp.lt.s32.totalorder %s4004_s8, %s4004_s8 }
  0x6f   :  { %p4011_p9 = por %p4010_p8, %p4009_p7 }
  0x71   :  { %p4012_p10 = pnand %p4011_p9, %p4005_p6 }
  0x73   :  { %4015 = shalt.err (!%p4012_p10)
}
  0x74   :  { %200 = dma.hbm_to_vmem [thread:$0]  %s4560_s6, 8192, %s195_s22, [#allocation18], %s4462_s29, %s4462_s29, %s4463_s26  }
  0x75   :  { %s4464_s1 = smov [#allocation20]   ;;  %s4465_s7 = smov [#allocation23]  }
  0x76   :  { %s220_s2 = sshll.u32 %s4464_s1, 4  ;;  %s244_s10 = sshll.u32 %s4465_s7, 4  ;;  %s221_s2 = int_to_ptr.vmem [resolvable:$true] %s220_s2  ;;  %s245_s10 = int_to_ptr.vmem [resolvable:$true] %s244_s10 }
  0x77   :  { %s4024_s11 = scalar_lea.vmem %s221_s2, 2048  ;;  %p4029_p12 = scmp.lt.s32.totalorder %s221_s2, %s221_s2 }
  0x78   :  { %p4025_p11 = scmp.ne.s32.totalorder %s221_s2, %s4024_s11  ;;  %p4030_p13 = scmp.lt.s32.totalorder %s4024_s11, %s4024_s11 }
  0x7a   :  { %p4031_p0 = por %p4030_p13, %p4029_p12 }
  0x7c   :  { %p4032_p1 = pnand %p4031_p0, %p4025_p11 }
  0x7e   :  { %4035 = shalt.err (!%p4032_p1)
}
  0x7f   :  { %226 = dma.hbm_to_vmem [thread:$0]  %s4575_s27, 2048, %s221_s2, [#allocation21], %s4456_s0, %s4456_s0, %s4457_s28  }
  0x80   :  { %s4044_s19 = scalar_lea.vmem %s245_s10, 2048  ;;  %p4049_p3 = scmp.lt.s32.totalorder %s245_s10, %s245_s10 }
  0x81   :  { %p4045_p2 = scmp.ne.s32.totalorder %s245_s10, %s4044_s19  ;;  %p4050_p4 = scmp.lt.s32.totalorder %s4044_s19, %s4044_s19 }
  0x83   :  { %p4051_p5 = por %p4050_p4, %p4049_p3 }
  0x85   :  { %p4052_p6 = pnand %p4051_p5, %p4045_p2 }
  0x87   :  { %4055 = shalt.err (!%p4052_p6)
}
  0x88   :  { %250 = dma.hbm_to_vmem [thread:$0]  %s4585_s30, 2048, %s245_s10, [#allocation24], %s4456_s0, %s4456_s0, %s4457_s28  }
  0x89   :  { %s4466_s6 = smov [#allocation2]   ;;  %s4467_s13 = smov [#allocation7]  }
  0x8a   :  { %s91_s15 = sshll.u32 %s4466_s6, 4  ;;  %s113_s16 = sshll.u32 %s4467_s13, 4  ;;  %s92_s15 = int_to_ptr.vmem [resolvable:$true] %s91_s15  ;;  %s114_s16 = int_to_ptr.vmem [resolvable:$true] %s113_s16 }
  0x8b   :  { %s4064_s18 = scalar_lea.vmem %s92_s15, 128  ;;  %p4069_p8 = scmp.lt.s32.totalorder %s92_s15, %s92_s15 }
  0x8c   :  { %p4065_p7 = scmp.ne.s32.totalorder %s92_s15, %s4064_s18  ;;  %p4070_p9 = scmp.lt.s32.totalorder %s4064_s18, %s4064_s18 }
  0x8e   :  { %p4071_p10 = por %p4070_p9, %p4069_p8 }
  0x90   :  { %p4072_p11 = pnand %p4071_p10, %p4065_p7 }
  0x92   :  { %4075 = shalt.err (!%p4072_p11)
}
  0x93   :  { %94 = dma.hbm_to_vmem [thread:$0]  %s4500_s9, 128, %s92_s15, [#allocation3]  }
  0x94   :  { %s4084_s27 = scalar_lea.vmem %s114_s16, 128  ;;  %p4089_p13 = scmp.lt.s32.totalorder %s114_s16, %s114_s16 }
  0x95   :  { %p4085_p12 = scmp.ne.s32.totalorder %s114_s16, %s4084_s27  ;;  %p4090_p0 = scmp.lt.s32.totalorder %s4084_s27, %s4084_s27 }
  0x97   :  { %p4091_p1 = por %p4090_p0, %p4089_p13 }
  0x99   :  { %p4092_p2 = pnand %p4091_p1, %p4085_p12 }
  0x9b   :  { %4095 = shalt.err (!%p4092_p2)
}
  0x9c   :  { %116 = dma.hbm_to_vmem [thread:$0]  %s4510_s17, 128, %s114_s16, [#allocation6]  }
  0x9d   :  { %s4468_s30 = smov [#allocation10]   ;;  %s4469_s23 = smov [#allocation13]  }
  0x9e   :  { %s137_s22 = sshll.u32 %s4468_s30, 4  ;;  %s156_s8 = sshll.u32 %s4469_s23, 4  ;;  %s138_s22 = int_to_ptr.vmem [resolvable:$true] %s137_s22  ;;  %s157_s8 = int_to_ptr.vmem [resolvable:$true] %s156_s8 }
  0x9f   :  { %s4104_s1 = scalar_lea.vmem %s138_s22, 128  ;;  %p4109_p4 = scmp.lt.s32.totalorder %s138_s22, %s138_s22 }
  0xa0   :  { %p4105_p3 = scmp.ne.s32.totalorder %s138_s22, %s4104_s1  ;;  %p4110_p5 = scmp.lt.s32.totalorder %s4104_s1, %s4104_s1 }
  0xa2   :  { %p4111_p6 = por %p4110_p5, %p4109_p4 }
  0xa4   :  { %p4112_p7 = pnand %p4111_p6, %p4105_p3 }
  0xa6   :  { %4115 = shalt.err (!%p4112_p7)
}
  0xa7   :  { %140 = dma.hbm_to_vmem [thread:$0]  %s4530_s3, 128, %s138_s22, [#allocation9]  }
  0xa8   :  { %s4124_s9 = scalar_lea.vmem %s157_s8, 8192  ;;  %p4129_p9 = scmp.lt.s32.totalorder %s157_s8, %s157_s8 }
  0xa9   :  { %p4125_p8 = scmp.ne.s32.totalorder %s157_s8, %s4124_s9  ;;  %p4130_p10 = scmp.lt.s32.totalorder %s4124_s9, %s4124_s9 }
  0xab   :  { %p4131_p11 = por %p4130_p10, %p4129_p9 }
  0xad   :  { %p4132_p12 = pnand %p4131_p11, %p4125_p8 }
  0xaf   :  { %4135 = shalt.err (!%p4132_p12)
}
  0xb0   :  { %162 = dma.hbm_to_vmem [thread:$0]  %s4540_s14, 8192, %s157_s8, [#allocation12], %s4462_s29, %s4462_s29, %s4463_s26  }
  0xb1   :  { %s4470_s17 = smov [#allocation16]   ;;  %s4471_s7 = smov [#allocation19]  }
  0xb2   :  { %s180_s2 = sshll.u32 %s4470_s17, 4  ;;  %s206_s10 = sshll.u32 %s4471_s7, 4  ;;  %s181_s2 = int_to_ptr.vmem [resolvable:$true] %s180_s2  ;;  %s207_s10 = int_to_ptr.vmem [resolvable:$true] %s206_s10 }
  0xb3   :  { %s4144_s11 = scalar_lea.vmem %s181_s2, 8192  ;;  %p4149_p0 = scmp.lt.s32.totalorder %s181_s2, %s181_s2 }
  0xb4   :  { %p4145_p13 = scmp.ne.s32.totalorder %s181_s2, %s4144_s11  ;;  %p4150_p1 = scmp.lt.s32.totalorder %s4144_s11, %s4144_s11 }
  0xb6   :  { %p4151_p2 = por %p4150_p1, %p4149_p0 }
  0xb8   :  { %p4152_p3 = pnand %p4151_p2, %p4145_p13 }
  0xba   :  { %4155 = shalt.err (!%p4152_p3)
}
  0xbb   :  { %186 = dma.hbm_to_vmem [thread:$0]  %s4550_s24, 8192, %s181_s2, [#allocation15], %s4462_s29, %s4462_s29, %s4463_s26  }
  0xbc   :  { %s4164_s3 = scalar_lea.vmem %s207_s10, 8192  ;;  %p4169_p5 = scmp.lt.s32.totalorder %s207_s10, %s207_s10 }
  0xbd   :  { %p4165_p4 = scmp.ne.s32.totalorder %s207_s10, %s4164_s3  ;;  %p4170_p6 = scmp.lt.s32.totalorder %s4164_s3, %s4164_s3 }
  0xbf   :  { %p4171_p7 = por %p4170_p6, %p4169_p5 }
  0xc1   :  { %p4172_p8 = pnand %p4171_p7, %p4165_p4 }
  0xc3   :  { %4175 = shalt.err (!%p4172_p8)
}
  0xc4   :  { %212 = dma.hbm_to_vmem [thread:$0]  %s4565_s12, 8192, %s207_s10, [#allocation18], %s4462_s29, %s4462_s29, %s4463_s26  }
  0xc5   :  { %s4472_s14 = smov [#allocation22]   ;;  %s4473_s6 = smov [#allocation25]  }
  0xc6   :  { %s232_s19 = sshll.u32 %s4472_s14, 4  ;;  %s258_s15 = sshll.u32 %s4473_s6, 4  ;;  %s233_s19 = int_to_ptr.vmem [resolvable:$true] %s232_s19  ;;  %s259_s15 = int_to_ptr.vmem [resolvable:$true] %s258_s15 }
  0xc7   :  { %s4184_s13 = scalar_lea.vmem %s233_s19, 2048  ;;  %p4189_p10 = scmp.lt.s32.totalorder %s233_s19, %s233_s19 }
  0xc8   :  { %p4185_p9 = scmp.ne.s32.totalorder %s233_s19, %s4184_s13  ;;  %p4190_p11 = scmp.lt.s32.totalorder %s4184_s13, %s4184_s13 }
  0xca   :  { %p4191_p12 = por %p4190_p11, %p4189_p10 }
  0xcc   :  { %p4192_p13 = pnand %p4191_p12, %p4185_p9 }
  0xce   :  { %4195 = shalt.err (!%p4192_p13)
}
  0xcf   :  { %238 = dma.hbm_to_vmem [thread:$0]  %s4580_s4, 2048, %s233_s19, [#allocation21], %s4456_s0, %s4456_s0, %s4457_s28  }
  0xd0   :  { %s4204_s24 = scalar_lea.vmem %s259_s15, 2048  ;;  %p4209_p1 = scmp.lt.s32.totalorder %s259_s15, %s259_s15 }
  0xd1   :  { %p4205_p0 = scmp.ne.s32.totalorder %s259_s15, %s4204_s24  ;;  %p4210_p2 = scmp.lt.s32.totalorder %s4204_s24, %s4204_s24 }
  0xd3   :  { %p4211_p3 = por %p4210_p2, %p4209_p1 }
  0xd5   :  { %p4212_p4 = pnand %p4211_p3, %p4205_p0 }
  0xd7   :  { %4215 = shalt.err (!%p4212_p4)
}
  0xd8   :  { %s4979_s12 = sld [smem:[#allocation60_spill]]  ;;  %s4474_s29 = smov [#allocation26]  }
  0xd9   :  { %s272_s26 = sshll.u32 %s4474_s29, 4  ;;  %s273_s26 = int_to_ptr.vmem [resolvable:$true] %s272_s26 }
  0xda   :  { %s4224_s16 = scalar_lea.vmem %s273_s26, 2048  ;;  %p4229_p6 = scmp.lt.s32.totalorder %s273_s26, %s273_s26 }
  0xdb   :  { %p4225_p5 = scmp.ne.s32.totalorder %s273_s26, %s4224_s16  ;;  %p4230_p7 = scmp.lt.s32.totalorder %s4224_s16, %s4224_s16 }
  0xdd   :  { %p4231_p8 = por %p4230_p7, %p4229_p6 }
  0xde   :  { %264 = dma.hbm_to_vmem [thread:$0]  %s4979_s12, 2048, %s259_s15, [#allocation24], %s4456_s0, %s4456_s0, %s4457_s28  }
  0xdf   :  { %p4232_p9 = pnand %p4231_p8, %p4225_p5 }
  0xe1   :  { %4235 = shalt.err (!%p4232_p9)
}
  0xe2   :  { %s4980_s4 = sld [smem:[#allocation62_spill]] }
  0xe8   :  { %278 = dma.hbm_to_vmem [thread:$0]  %s4980_s4, 2048, %s273_s26, [#allocation27], %s4456_s0, %s4456_s0, %s4457_s28  }
  0xe9   :  { %4396 = dma.done.wait [#allocation3], 128  }
  0xea   :  { %4397 = vsyncadd [#allocation3], 4294967168 }
  0xeb   :  { %4398 = dma.done.wait [#allocation6], 1152  }
  0xec   :  { %4399 = vsyncadd [#allocation6], 4294966144 }
  0xed   :  { %4400 = dma.done.wait [#allocation9], 256  }
  0xee   :  { %4401 = vsyncadd [#allocation9], 4294967040 }
  0xef   :  { %4402 = dma.done.wait [#allocation12], 8320  }
  0xf0   :  { %4403 = vsyncadd [#allocation12], 4294958976 }
  0xf1   :  { %4404 = dma.done.wait [#allocation15], 16384  }
  0xf2   :  { %4405 = vsyncadd [#allocation15], 4294950912 }
  0xf3   :  { %4406 = dma.done.wait [#allocation18], 16384  }
  0xf4   :  { %4407 = vsyncadd [#allocation18], 4294950912 }
  0xf5   :  { %4408 = dma.done.wait [#allocation21], 4096  }
  0xf6   :  { %4409 = vsyncadd [#allocation21], 4294963200 }
  0xf7   :  { %4410 = dma.done.wait [#allocation24], 4096  }
  0xf8   :  { %4411 = vsyncadd [#allocation24], 4294963200 }
  0xf9   :  { %4412 = dma.done.wait [#allocation27], 2048  }
  0xfa   :  { %4413 = vsyncadd [#allocation27], 4294965248  ;;  %v4475_v0 = vmov 0.0   ;;  %v4476_v1 = vmov 0   ;;  %v459_v2 = vld [vmem:[#allocation14 + $0x1e8] sm:$0xff]  ;;  %v461_v3 = vld [vmem:[#allocation14 + $0x1f8] sm:$0xff] }
  0xfb   :  { %526 = vmatprep.mubr.f32.mxu0 %v4475_v0  ;;  %597 = vmatprep.mubr.f32.mxu1 %v4475_v0  ;;  %v458_v4 = vld [vmem:[#allocation14 + $0x1e0] sm:$0xff]  ;;  %v460_v5 = vld [vmem:[#allocation14 + $0x1f0] sm:$0xff]  ;;  %v455_v6 = vld [vmem:[#allocation14 + $0x1c8] sm:$0xff]  ;;  %s4981_s0 = sld [smem:[#allocation54_spill]]  ;;  %vm4477_vm0 = vmmov 0   ;;  %vm2204_vm1 = vcmask 1041409  }
  0xfc   :  { %3873 = vset.pattern.permute.xlu0 %v4476_v1  ;;  %462 = vmatprep.subr.mxu0 %v459_v2  ;;  %v457_v7 = vld [vmem:[#allocation14 + $0x1d8] sm:$0xff]  ;;  %v454_v8 = vld [vmem:[#allocation14 + $0x1c0] sm:$0xff]  ;;  %v456_v9 = vld [vmem:[#allocation14 + $0x1d0] sm:$0xff]  ;;  %s4982_s28 = sld [smem:[#allocation56_spill]]  ;;  %vm2207_vm2 = vcmask 1042434   ;;  %vm2210_vm3 = vcmask 1043459  }
  0xfd   :  { %533 = vmatprep.subr.mxu1 %v461_v3  ;;  %463 = vmatpush1.msra.mxu0 %v458_v4  ;;  %v451_v10 = vld [vmem:[#allocation14 + $0x1a8] sm:$0xff]  ;;  %v453_v11 = vld [vmem:[#allocation14 + $0x1b8] sm:$0xff]  ;;  %v450_v12 = vld [vmem:[#allocation14 + $0x1a0] sm:$0xff]  ;;  %s4983_s18 = sld [smem:[#allocation55_spill]]  ;;  %vm2213_vm4 = vcmask 1044484   ;;  %vm2216_vm5 = vcmask 1045509  }
  0xfe   :  { %534 = vmatpush1.msra.mxu1 %v460_v5  ;;  %464 = vmatprep.subr.mxu0 %v455_v6  ;;  %v452_v13 = vld [vmem:[#allocation14 + $0x1b0] sm:$0xff]  ;;  %v447_v14 = vld [vmem:[#allocation14 + $0x188] sm:$0xff]  ;;  %v449_v15 = vld [vmem:[#allocation14 + $0x198] sm:$0xff]  ;;  %s4984_s27 = sld [smem:[#allocation57_spill]]  ;;  %vm2219_vm6 = vcmask 1046534   ;;  %vm2222_vm7 = vcmask 1047559  }
  0xff   :  { %535 = vmatprep.subr.mxu1 %v457_v7  ;;  %465 = vmatpush1.msra.mxu0 %v454_v8  ;;  %v446_v16 = vld [vmem:[#allocation14 + $0x180] sm:$0xff]  ;;  %v448_v17 = vld [vmem:[#allocation14 + $0x190] sm:$0xff]  ;;  %v443_v18 = vld [vmem:[#allocation14 + $0x168] sm:$0xff]  ;;  %s4985_s30 = sld [smem:[#allocation58_spill]]  ;;  %vm2226_vm9 = vcmask 64512   ;;  %s4479_s22 = smov [#allocation29]  }
 0x100   :  { %536 = vmatpush1.msra.mxu1 %v456_v9  ;;  %466 = vmatprep.subr.mxu0 %v451_v10  ;;  %v445_v19 = vld [vmem:[#allocation14 + $0x178] sm:$0xff]  ;;  %v442_v20 = vld [vmem:[#allocation14 + $0x160] sm:$0xff]  ;;  %v444_v21 = vld [vmem:[#allocation14 + $0x170] sm:$0xff]  ;;  %s3287_s23 = sshll.u32 %s4479_s22, 4  ;;  %s3288_s23 = int_to_ptr.vmem [resolvable:$true] %s3287_s23 }
 0x101   :  { %537 = vmatprep.subr.mxu1 %v453_v11  ;;  %467 = vmatpush1.msra.mxu0 %v450_v12  ;;  %v439_v22 = vld [vmem:[#allocation14 + $0x148] sm:$0xff]  ;;  %v441_v23 = vld [vmem:[#allocation14 + $0x158] sm:$0xff]  ;;  %v438_v24 = vld [vmem:[#allocation14 + $0x140] sm:$0xff]  ;;  %s4236_s8 = scalar_lea.vmem %s3288_s23, 128  ;;  %p4241_p11 = scmp.lt.s32.totalorder %s3288_s23, %s3288_s23 }
 0x102   :  { %538 = vmatpush1.msra.mxu1 %v452_v13  ;;  %468 = vmatprep.subr.mxu0 %v447_v14  ;;  %v440_v25 = vld [vmem:[#allocation14 + $0x150] sm:$0xff]  ;;  %v435_v26 = vld [vmem:[#allocation14 + $0x128] sm:$0xff]  ;;  %v437_v27 = vld [vmem:[#allocation14 + $0x138] sm:$0xff]  ;;  %p4237_p10 = scmp.ne.s32.totalorder %s3288_s23, %s4236_s8  ;;  %p4242_p12 = scmp.lt.s32.totalorder %s4236_s8, %s4236_s8 }
 0x103   :  { %539 = vmatprep.subr.mxu1 %v449_v15  ;;  %469 = vmatpush1.msra.mxu0 %v446_v16  ;;  %v434_v28 = vld [vmem:[#allocation14 + $0x120] sm:$0xff]  ;;  %v436_v29 = vld [vmem:[#allocation14 + $0x130] sm:$0xff]  ;;  %v431_v30 = vld [vmem:[#allocation14 + $0x108] sm:$0xff] }
 0x104   :  { %540 = vmatpush1.msra.mxu1 %v448_v17  ;;  %470 = vmatprep.subr.mxu0 %v443_v18  ;;  %v433_v31 = vld [vmem:[#allocation14 + $0x118] sm:$0xff]  ;;  %v430_v32 = vld [vmem:[#allocation14 + $0x100] sm:$0xff]  ;;  %v432_v33 = vld [vmem:[#allocation14 + $0x110] sm:$0xff]  ;;  %p4243_p13 = por %p4242_p12, %p4241_p11 }
 0x105   :  { %541 = vmatprep.subr.mxu1 %v445_v19  ;;  %471 = vmatpush1.msra.mxu0 %v442_v20  ;;  %v427_v34 = vld [vmem:[#allocation14 + $0xe8] sm:$0xff]  ;;  %v429_v35 = vld [vmem:[#allocation14 + $0xf8] sm:$0xff]  ;;  %v426_v36 = vld [vmem:[#allocation14 + $0xe0] sm:$0xff] }
 0x106   :  { %542 = vmatpush1.msra.mxu1 %v444_v21  ;;  %472 = vmatprep.subr.mxu0 %v439_v22  ;;  %v428_v37 = vld [vmem:[#allocation14 + $0xf0] sm:$0xff]  ;;  %v423_v38 = vld [vmem:[#allocation14 + $0xc8] sm:$0xff]  ;;  %v425_v39 = vld [vmem:[#allocation14 + $0xd8] sm:$0xff]  ;;  %p4244_p0 = pnand %p4243_p13, %p4237_p10 }
 0x107   :  { %543 = vmatprep.subr.mxu1 %v441_v23  ;;  %473 = vmatpush1.msra.mxu0 %v438_v24  ;;  %v422_v40 = vld [vmem:[#allocation14 + $0xc0] sm:$0xff]  ;;  %v424_v41 = vld [vmem:[#allocation14 + $0xd0] sm:$0xff]  ;;  %v419_v42 = vld [vmem:[#allocation14 + $0xa8] sm:$0xff] }
 0x108   :  { %544 = vmatpush1.msra.mxu1 %v440_v25  ;;  %474 = vmatprep.subr.mxu0 %v435_v26  ;;  %v421_v43 = vld [vmem:[#allocation14 + $0xb8] sm:$0xff]  ;;  %v418_v44 = vld [vmem:[#allocation14 + $0xa0] sm:$0xff]  ;;  %v420_v45 = vld [vmem:[#allocation14 + $0xb0] sm:$0xff] }
 0x109   :  { %545 = vmatprep.subr.mxu1 %v437_v27  ;;  %475 = vmatpush1.msra.mxu0 %v434_v28  ;;  %v415_v46 = vld [vmem:[#allocation14 + $0x88] sm:$0xff]  ;;  %v417_v47 = vld [vmem:[#allocation14 + $0x98] sm:$0xff]  ;;  %v414_v48 = vld [vmem:[#allocation14 + $0x80] sm:$0xff] }
 0x10a   :  { %546 = vmatpush1.msra.mxu1 %v436_v29  ;;  %476 = vmatprep.subr.mxu0 %v431_v30  ;;  %v416_v49 = vld [vmem:[#allocation14 + $0x90] sm:$0xff]  ;;  %v411_v50 = vld [vmem:[#allocation14 + $0x68] sm:$0xff]  ;;  %v413_v51 = vld [vmem:[#allocation14 + $0x78] sm:$0xff] }
 0x10b   :  { %547 = vmatprep.subr.mxu1 %v433_v31  ;;  %477 = vmatpush1.msra.mxu0 %v430_v32  ;;  %v410_v52 = vld [vmem:[#allocation14 + $0x60] sm:$0xff]  ;;  %v412_v53 = vld [vmem:[#allocation14 + $0x70] sm:$0xff]  ;;  %v407_v54 = vld [vmem:[#allocation14 + $0x48] sm:$0xff] }
 0x10c   :  { %548 = vmatpush1.msra.mxu1 %v432_v33  ;;  %478 = vmatprep.subr.mxu0 %v427_v34  ;;  %v409_v55 = vld [vmem:[#allocation14 + $0x58] sm:$0xff]  ;;  %v406_v56 = vld [vmem:[#allocation14 + $0x40] sm:$0xff]  ;;  %v408_v57 = vld [vmem:[#allocation14 + $0x50] sm:$0xff] }
 0x10d   :  { %549 = vmatprep.subr.mxu1 %v429_v35  ;;  %479 = vmatpush1.msra.mxu0 %v426_v36  ;;  %v403_v58 = vld [vmem:[#allocation14 + $0x28] sm:$0xff]  ;;  %v405_v59 = vld [vmem:[#allocation14 + $0x38] sm:$0xff]  ;;  %v402_v60 = vld [vmem:[#allocation14 + $0x20] sm:$0xff] }
 0x10e   :  { %550 = vmatpush1.msra.mxu1 %v428_v37  ;;  %480 = vmatprep.subr.mxu0 %v423_v38  ;;  %v404_v61 = vld [vmem:[#allocation14 + $0x30] sm:$0xff]  ;;  %v399_v62 = vld [vmem:[#allocation14 + $0x8] sm:$0xff]  ;;  %v401_v63 = vld [vmem:[#allocation14 + $0x18] sm:$0xff] }
 0x10f   :  { %551 = vmatprep.subr.mxu1 %v425_v39  ;;  %481 = vmatpush1.msra.mxu0 %v422_v40  ;;  %v398_v1 = vld [vmem:[#allocation14] sm:$0xff]  ;;  %v400_v2 = vld [vmem:[#allocation14 + $0x10] sm:$0xff]  ;;  %v397_v3 = vld [vmem:[#allocation2] sm:$0xff] }
 0x110   :  { %552 = vmatpush1.msra.mxu1 %v424_v41  ;;  %482 = vmatprep.subr.mxu0 %v419_v42  ;;  %v394_v4 = vld [vmem:[#allocation13 + $0x1e8] sm:$0xff]  ;;  %v396_v5 = vld [vmem:[#allocation13 + $0x1f8] sm:$0xff]  ;;  %v393_v6 = vld [vmem:[#allocation13 + $0x1e0] sm:$0xff] }
 0x111   :  { %553 = vmatprep.subr.mxu1 %v421_v43  ;;  %483 = vmatpush1.msra.mxu0 %v418_v44  ;;  %v395_v7 = vld [vmem:[#allocation13 + $0x1f0] sm:$0xff]  ;;  %v390_v8 = vld [vmem:[#allocation13 + $0x1c8] sm:$0xff]  ;;  %v392_v9 = vld [vmem:[#allocation13 + $0x1d8] sm:$0xff] }
 0x112   :  { %554 = vmatpush1.msra.mxu1 %v420_v45  ;;  %484 = vmatprep.subr.mxu0 %v415_v46  ;;  %v389_v10 = vld [vmem:[#allocation13 + $0x1c0] sm:$0xff]  ;;  %v391_v11 = vld [vmem:[#allocation13 + $0x1d0] sm:$0xff]  ;;  %v386_v12 = vld [vmem:[#allocation13 + $0x1a8] sm:$0xff] }
 0x113   :  { %555 = vmatprep.subr.mxu1 %v417_v47  ;;  %485 = vmatpush1.msra.mxu0 %v414_v48  ;;  %v388_v13 = vld [vmem:[#allocation13 + $0x1b8] sm:$0xff]  ;;  %v385_v14 = vld [vmem:[#allocation13 + $0x1a0] sm:$0xff]  ;;  %v387_v15 = vld [vmem:[#allocation13 + $0x1b0] sm:$0xff] }
 0x114   :  { %556 = vmatpush1.msra.mxu1 %v416_v49  ;;  %486 = vmatprep.subr.mxu0 %v411_v50  ;;  %v382_v16 = vld [vmem:[#allocation13 + $0x188] sm:$0xff]  ;;  %v384_v17 = vld [vmem:[#allocation13 + $0x198] sm:$0xff]  ;;  %v381_v18 = vld [vmem:[#allocation13 + $0x180] sm:$0xff] }
 0x115   :  { %557 = vmatprep.subr.mxu1 %v413_v51  ;;  %487 = vmatpush1.msra.mxu0 %v410_v52  ;;  %v383_v19 = vld [vmem:[#allocation13 + $0x190] sm:$0xff]  ;;  %v378_v20 = vld [vmem:[#allocation13 + $0x168] sm:$0xff]  ;;  %v380_v21 = vld [vmem:[#allocation13 + $0x178] sm:$0xff] }
 0x116   :  { %558 = vmatpush1.msra.mxu1 %v412_v53  ;;  %488 = vmatprep.subr.mxu0 %v407_v54  ;;  %v377_v22 = vld [vmem:[#allocation13 + $0x160] sm:$0xff]  ;;  %v379_v23 = vld [vmem:[#allocation13 + $0x170] sm:$0xff]  ;;  %v374_v24 = vld [vmem:[#allocation13 + $0x148] sm:$0xff] }
 0x117   :  { %559 = vmatprep.subr.mxu1 %v409_v55  ;;  %489 = vmatpush1.msra.mxu0 %v406_v56  ;;  %v376_v25 = vld [vmem:[#allocation13 + $0x158] sm:$0xff]  ;;  %v373_v26 = vld [vmem:[#allocation13 + $0x140] sm:$0xff]  ;;  %v375_v27 = vld [vmem:[#allocation13 + $0x150] sm:$0xff] }
 0x118   :  { %560 = vmatpush1.msra.mxu1 %v408_v57  ;;  %490 = vmatprep.subr.mxu0 %v403_v58  ;;  %v370_v28 = vld [vmem:[#allocation13 + $0x128] sm:$0xff]  ;;  %v372_v29 = vld [vmem:[#allocation13 + $0x138] sm:$0xff]  ;;  %v369_v30 = vld [vmem:[#allocation13 + $0x120] sm:$0xff] }
 0x119   :  { %561 = vmatprep.subr.mxu1 %v405_v59  ;;  %491 = vmatpush1.msra.mxu0 %v402_v60  ;;  %v371_v31 = vld [vmem:[#allocation13 + $0x130] sm:$0xff]  ;;  %v366_v32 = vld [vmem:[#allocation13 + $0x108] sm:$0xff]  ;;  %v368_v33 = vld [vmem:[#allocation13 + $0x118] sm:$0xff] }
 0x11a   :  { %562 = vmatpush1.msra.mxu1 %v404_v61  ;;  %492 = vmatprep.subr.mxu0 %v399_v62  ;;  %v365_v34 = vld [vmem:[#allocation13 + $0x100] sm:$0xff]  ;;  %v367_v35 = vld [vmem:[#allocation13 + $0x110] sm:$0xff]  ;;  %v362_v36 = vld [vmem:[#allocation13 + $0xe8] sm:$0xff] }
 0x11b   :  { %563 = vmatprep.subr.mxu1 %v401_v63  ;;  %493 = vmatpush1.msra.mxu0 %v398_v1  ;;  %v364_v37 = vld [vmem:[#allocation13 + $0xf8] sm:$0xff]  ;;  %v361_v38 = vld [vmem:[#allocation13 + $0xe0] sm:$0xff]  ;;  %v363_v39 = vld [vmem:[#allocation13 + $0xf0] sm:$0xff] }
 0x11c   :  { %564 = vmatpush1.msra.mxu1 %v400_v2  ;;  %527 = vmatmul.mubr.f32.vlgmr.msra.gmra.mxu0 %v397_v3  ;;  %v358_v40 = vld [vmem:[#allocation13 + $0xc8] sm:$0xff]  ;;  %v360_v41 = vld [vmem:[#allocation13 + $0xd8] sm:$0xff]  ;;  %v357_v42 = vld [vmem:[#allocation13 + $0xc0] sm:$0xff] }
 0x11d   :  { %604 = vmatprep.subr.mxu0 %v394_v4  ;;  %675 = vmatprep.subr.mxu1 %v396_v5  ;;  %v359_v43 = vld [vmem:[#allocation13 + $0xd0] sm:$0xff]  ;;  %v354_v44 = vld [vmem:[#allocation13 + $0xa8] sm:$0xff]  ;;  %v356_v45 = vld [vmem:[#allocation13 + $0xb8] sm:$0xff] }
 0x11e   :  { %598 = vmatmul.mubr.f32.vlgmr.msra.gmra.mxu1 %v397_v3  ;;  %605 = vmatpush1.msra.mxu0 %v393_v6  ;;  %v353_v46 = vld [vmem:[#allocation13 + $0xa0] sm:$0xff]  ;;  %v355_v47 = vld [vmem:[#allocation13 + $0xb0] sm:$0xff]  ;;  %v350_v48 = vld [vmem:[#allocation13 + $0x88] sm:$0xff] }
 0x11f   :  { %676 = vmatpush1.msra.mxu1 %v395_v7  ;;  %606 = vmatprep.subr.mxu0 %v390_v8  ;;  %v352_v49 = vld [vmem:[#allocation13 + $0x98] sm:$0xff]  ;;  %v349_v50 = vld [vmem:[#allocation13 + $0x80] sm:$0xff]  ;;  %v351_v51 = vld [vmem:[#allocation13 + $0x90] sm:$0xff] }
 0x120   :  { %677 = vmatprep.subr.mxu1 %v392_v9  ;;  %607 = vmatpush1.msra.mxu0 %v389_v10  ;;  %v346_v52 = vld [vmem:[#allocation13 + $0x68] sm:$0xff]  ;;  %v348_v53 = vld [vmem:[#allocation13 + $0x78] sm:$0xff]  ;;  %v345_v54 = vld [vmem:[#allocation13 + $0x60] sm:$0xff] }
 0x121   :  { %678 = vmatpush1.msra.mxu1 %v391_v11  ;;  %608 = vmatprep.subr.mxu0 %v386_v12  ;;  %v347_v55 = vld [vmem:[#allocation13 + $0x70] sm:$0xff]  ;;  %v342_v56 = vld [vmem:[#allocation13 + $0x48] sm:$0xff]  ;;  %v344_v57 = vld [vmem:[#allocation13 + $0x58] sm:$0xff] }
 0x122   :  { %679 = vmatprep.subr.mxu1 %v388_v13  ;;  %609 = vmatpush1.msra.mxu0 %v385_v14  ;;  %v341_v58 = vld [vmem:[#allocation13 + $0x40] sm:$0xff]  ;;  %v343_v59 = vld [vmem:[#allocation13 + $0x50] sm:$0xff]  ;;  %v338_v60 = vld [vmem:[#allocation13 + $0x28] sm:$0xff] }
 0x123   :  { %680 = vmatpush1.msra.mxu1 %v387_v15  ;;  %610 = vmatprep.subr.mxu0 %v382_v16  ;;  %v340_v61 = vld [vmem:[#allocation13 + $0x38] sm:$0xff]  ;;  %v337_v62 = vld [vmem:[#allocation13 + $0x20] sm:$0xff]  ;;  %v339_v63 = vld [vmem:[#allocation13 + $0x30] sm:$0xff] }
 0x124   :  { %681 = vmatprep.subr.mxu1 %v384_v17  ;;  %611 = vmatpush1.msra.mxu0 %v381_v18  ;;  %v334_v1 = vld [vmem:[#allocation13 + $0x8] sm:$0xff]  ;;  %v336_v2 = vld [vmem:[#allocation13 + $0x18] sm:$0xff]  ;;  %v333_v3 = vld [vmem:[#allocation13] sm:$0xff] }
 0x125   :  { %682 = vmatpush1.msra.mxu1 %v383_v19  ;;  %612 = vmatprep.subr.mxu0 %v378_v20  ;;  %v335_v4 = vld [vmem:[#allocation13 + $0x10] sm:$0xff]  ;;  %v330_v5 = vld [vmem:[%s4981_s0] sm:$0xff]  ;;  %v807_v6 = vld [vmem:[#allocation16 + $0x1e8] sm:$0xff] }
 0x126   :  { %683 = vmatprep.subr.mxu1 %v380_v21  ;;  %613 = vmatpush1.msra.mxu0 %v377_v22  ;;  %v809_v7 = vld [vmem:[#allocation16 + $0x1f8] sm:$0xff]  ;;  %v806_v8 = vld [vmem:[#allocation16 + $0x1e0] sm:$0xff]  ;;  %v808_v9 = vld [vmem:[#allocation16 + $0x1f0] sm:$0xff] }
 0x127   :  { %684 = vmatpush1.msra.mxu1 %v379_v23  ;;  %614 = vmatprep.subr.mxu0 %v374_v24  ;;  %v803_v10 = vld [vmem:[#allocation16 + $0x1c8] sm:$0xff]  ;;  %v805_v11 = vld [vmem:[#allocation16 + $0x1d8] sm:$0xff]  ;;  %v802_v12 = vld [vmem:[#allocation16 + $0x1c0] sm:$0xff] }
 0x128   :  { %685 = vmatprep.subr.mxu1 %v376_v25  ;;  %615 = vmatpush1.msra.mxu0 %v373_v26  ;;  %v804_v13 = vld [vmem:[#allocation16 + $0x1d0] sm:$0xff]  ;;  %v799_v14 = vld [vmem:[#allocation16 + $0x1a8] sm:$0xff]  ;;  %v801_v15 = vld [vmem:[#allocation16 + $0x1b8] sm:$0xff] }
 0x129   :  { %686 = vmatpush1.msra.mxu1 %v375_v27  ;;  %616 = vmatprep.subr.mxu0 %v370_v28  ;;  %v798_v16 = vld [vmem:[#allocation16 + $0x1a0] sm:$0xff]  ;;  %v800_v17 = vld [vmem:[#allocation16 + $0x1b0] sm:$0xff]  ;;  %v795_v18 = vld [vmem:[#allocation16 + $0x188] sm:$0xff] }
 0x12a   :  { %687 = vmatprep.subr.mxu1 %v372_v29  ;;  %617 = vmatpush1.msra.mxu0 %v369_v30  ;;  %v797_v19 = vld [vmem:[#allocation16 + $0x198] sm:$0xff]  ;;  %v794_v20 = vld [vmem:[#allocation16 + $0x180] sm:$0xff]  ;;  %v796_v21 = vld [vmem:[#allocation16 + $0x190] sm:$0xff] }
 0x12b   :  { %688 = vmatpush1.msra.mxu1 %v371_v31  ;;  %618 = vmatprep.subr.mxu0 %v366_v32  ;;  %v791_v22 = vld [vmem:[#allocation16 + $0x168] sm:$0xff]  ;;  %v793_v23 = vld [vmem:[#allocation16 + $0x178] sm:$0xff]  ;;  %v790_v24 = vld [vmem:[#allocation16 + $0x160] sm:$0xff] }
 0x12c   :  { %689 = vmatprep.subr.mxu1 %v368_v33  ;;  %619 = vmatpush1.msra.mxu0 %v365_v34  ;;  %v792_v25 = vld [vmem:[#allocation16 + $0x170] sm:$0xff]  ;;  %v787_v26 = vld [vmem:[#allocation16 + $0x148] sm:$0xff]  ;;  %v789_v27 = vld [vmem:[#allocation16 + $0x158] sm:$0xff] }
 0x12d   :  { %690 = vmatpush1.msra.mxu1 %v367_v35  ;;  %620 = vmatprep.subr.mxu0 %v362_v36  ;;  %v786_v28 = vld [vmem:[#allocation16 + $0x140] sm:$0xff]  ;;  %v788_v29 = vld [vmem:[#allocation16 + $0x150] sm:$0xff]  ;;  %v783_v30 = vld [vmem:[#allocation16 + $0x128] sm:$0xff] }
 0x12e   :  { %691 = vmatprep.subr.mxu1 %v364_v37  ;;  %621 = vmatpush1.msra.mxu0 %v361_v38  ;;  %v785_v31 = vld [vmem:[#allocation16 + $0x138] sm:$0xff]  ;;  %v782_v32 = vld [vmem:[#allocation16 + $0x120] sm:$0xff]  ;;  %v784_v33 = vld [vmem:[#allocation16 + $0x130] sm:$0xff] }
 0x12f   :  { %692 = vmatpush1.msra.mxu1 %v363_v39  ;;  %622 = vmatprep.subr.mxu0 %v358_v40  ;;  %v779_v34 = vld [vmem:[#allocation16 + $0x108] sm:$0xff]  ;;  %v781_v35 = vld [vmem:[#allocation16 + $0x118] sm:$0xff]  ;;  %v778_v36 = vld [vmem:[#allocation16 + $0x100] sm:$0xff] }
 0x130   :  { %693 = vmatprep.subr.mxu1 %v360_v41  ;;  %623 = vmatpush1.msra.mxu0 %v357_v42  ;;  %v780_v37 = vld [vmem:[#allocation16 + $0x110] sm:$0xff]  ;;  %v775_v38 = vld [vmem:[#allocation16 + $0xe8] sm:$0xff]  ;;  %v777_v39 = vld [vmem:[#allocation16 + $0xf8] sm:$0xff] }
 0x131   :  { %694 = vmatpush1.msra.mxu1 %v359_v43  ;;  %624 = vmatprep.subr.mxu0 %v354_v44  ;;  %v774_v40 = vld [vmem:[#allocation16 + $0xe0] sm:$0xff]  ;;  %v776_v41 = vld [vmem:[#allocation16 + $0xf0] sm:$0xff]  ;;  %v771_v42 = vld [vmem:[#allocation16 + $0xc8] sm:$0xff] }
 0x132   :  { %695 = vmatprep.subr.mxu1 %v356_v45  ;;  %625 = vmatpush1.msra.mxu0 %v353_v46  ;;  %v773_v43 = vld [vmem:[#allocation16 + $0xd8] sm:$0xff]  ;;  %v770_v44 = vld [vmem:[#allocation16 + $0xc0] sm:$0xff]  ;;  %v772_v45 = vld [vmem:[#allocation16 + $0xd0] sm:$0xff] }
 0x133   :  { %696 = vmatpush1.msra.mxu1 %v355_v47  ;;  %626 = vmatprep.subr.mxu0 %v350_v48  ;;  %v767_v46 = vld [vmem:[#allocation16 + $0xa8] sm:$0xff]  ;;  %v769_v47 = vld [vmem:[#allocation16 + $0xb8] sm:$0xff]  ;;  %v766_v48 = vld [vmem:[#allocation16 + $0xa0] sm:$0xff] }
 0x134   :  { %697 = vmatprep.subr.mxu1 %v352_v49  ;;  %627 = vmatpush1.msra.mxu0 %v349_v50  ;;  %v768_v49 = vld [vmem:[#allocation16 + $0xb0] sm:$0xff]  ;;  %v763_v50 = vld [vmem:[#allocation16 + $0x88] sm:$0xff] }
 0x135   :  { %698 = vmatpush1.msra.mxu1 %v351_v51  ;;  %628 = vmatprep.subr.mxu0 %v346_v52  ;;  %v765_v51 = vld [vmem:[#allocation16 + $0x98] sm:$0xff]  ;;  %v762_v52 = vld [vmem:[#allocation16 + $0x80] sm:$0xff] }
 0x136   :  { %699 = vmatprep.subr.mxu1 %v348_v53  ;;  %629 = vmatpush1.msra.mxu0 %v345_v54  ;;  %v764_v53 = vld [vmem:[#allocation16 + $0x90] sm:$0xff]  ;;  %v759_v54 = vld [vmem:[#allocation16 + $0x68] sm:$0xff] }
 0x137   :  { %700 = vmatpush1.msra.mxu1 %v347_v55  ;;  %630 = vmatprep.subr.mxu0 %v342_v56  ;;  %v761_v55 = vld [vmem:[#allocation16 + $0x78] sm:$0xff]  ;;  %v758_v56 = vld [vmem:[#allocation16 + $0x60] sm:$0xff] }
 0x138   :  { %701 = vmatprep.subr.mxu1 %v344_v57  ;;  %631 = vmatpush1.msra.mxu0 %v341_v58  ;;  %v760_v57 = vld [vmem:[#allocation16 + $0x70] sm:$0xff]  ;;  %v755_v58 = vld [vmem:[#allocation16 + $0x48] sm:$0xff] }
 0x139   :  { %702 = vmatpush1.msra.mxu1 %v343_v59  ;;  %632 = vmatprep.subr.mxu0 %v338_v60  ;;  %v757_v59 = vld [vmem:[#allocation16 + $0x58] sm:$0xff]  ;;  %v754_v60 = vld [vmem:[#allocation16 + $0x40] sm:$0xff] }
 0x13a   :  { %703 = vmatprep.subr.mxu1 %v340_v61  ;;  %633 = vmatpush1.msra.mxu0 %v337_v62  ;;  %v756_v61 = vld [vmem:[#allocation16 + $0x50] sm:$0xff]  ;;  %v751_v62 = vld [vmem:[#allocation16 + $0x28] sm:$0xff] }
 0x13b   :  { %704 = vmatpush1.msra.mxu1 %v339_v63  ;;  %634 = vmatprep.subr.mxu0 %v334_v1  ;;  %v753_v63 = vld [vmem:[#allocation16 + $0x38] sm:$0xff]  ;;  %v750_v1 = vld [vmem:[#allocation16 + $0x20] sm:$0xff] }
 0x13c   :  { %705 = vmatprep.subr.mxu1 %v336_v2  ;;  %635 = vmatpush1.msra.mxu0 %v333_v3  ;;  %v752_v2 = vld [vmem:[#allocation16 + $0x30] sm:$0xff]  ;;  %v747_v3 = vld [vmem:[#allocation16 + $0x8] sm:$0xff] }
 0x13d   :  { %668 = vmatprep.mubr.f32.mxu0 %v4475_v0  ;;  %706 = vmatpush1.msra.mxu1 %v335_v4  ;;  %v749_v4 = vld [vmem:[#allocation16 + $0x18] sm:$0xff] }
 0x13e   :  { %739 = vmatprep.mubr.f32.mxu1 %v4475_v0  ;;  %669 = vmatmul.mubr.f32.vlgmr.msra.gmra.mxu0 %v330_v5 }
 0x13f   :  { %740 = vmatmul.mubr.f32.vlgmr.msra.gmra.mxu1 %v330_v5  ;;  %810 = vmatprep.subr.mxu0 %v807_v6  ;;  %v746_v5 = vld [vmem:[#allocation16] sm:$0xff]  ;;  %v748_v6 = vld [vmem:[#allocation16 + $0x10] sm:$0xff] }
 0x140   :  { %881 = vmatprep.subr.mxu1 %v809_v7  ;;  %811 = vmatpush1.msra.mxu0 %v806_v8  ;;  %v331_v7 = vld [vmem:[%s4982_s28] sm:$0xff] }
 0x141   :  { %882 = vmatpush1.msra.mxu1 %v808_v9  ;;  %812 = vmatprep.subr.mxu0 %v803_v10  ;;  %v329_v8 = vld [vmem:[%s4983_s18] sm:$0xff]  ;;  %v1141_v9 = vld [vmem:[#allocation19 + $0x1e8] sm:$0xff]  ;;  %v1140_v10 = vld [vmem:[#allocation19 + $0x1e0] sm:$0xff] }
 0x142   :  { %883 = vmatprep.subr.mxu1 %v805_v11  ;;  %813 = vmatpush1.msra.mxu0 %v802_v12  ;;  %v1143_v11 = vld [vmem:[#allocation19 + $0x1f8] sm:$0xff]  ;;  %v1137_v12 = vld [vmem:[#allocation19 + $0x1c8] sm:$0xff] }
 0x143   :  { %884 = vmatpush1.msra.mxu1 %v804_v13  ;;  %814 = vmatprep.subr.mxu0 %v799_v14  ;;  %v1142_v13 = vld [vmem:[#allocation19 + $0x1f0] sm:$0xff]  ;;  %v1136_v14 = vld [vmem:[#allocation19 + $0x1c0] sm:$0xff] }
 0x144   :  { %885 = vmatprep.subr.mxu1 %v801_v15  ;;  %815 = vmatpush1.msra.mxu0 %v798_v16  ;;  %v1139_v15 = vld [vmem:[#allocation19 + $0x1d8] sm:$0xff]  ;;  %v1133_v16 = vld [vmem:[#allocation19 + $0x1a8] sm:$0xff] }
 0x145   :  { %886 = vmatpush1.msra.mxu1 %v800_v17  ;;  %816 = vmatprep.subr.mxu0 %v795_v18  ;;  %v1138_v17 = vld [vmem:[#allocation19 + $0x1d0] sm:$0xff]  ;;  %v1132_v18 = vld [vmem:[#allocation19 + $0x1a0] sm:$0xff] }
 0x146   :  { %887 = vmatprep.subr.mxu1 %v797_v19  ;;  %817 = vmatpush1.msra.mxu0 %v794_v20  ;;  %v1135_v19 = vld [vmem:[#allocation19 + $0x1b8] sm:$0xff]  ;;  %v1129_v20 = vld [vmem:[#allocation19 + $0x188] sm:$0xff] }
 0x147   :  { %888 = vmatpush1.msra.mxu1 %v796_v21  ;;  %818 = vmatprep.subr.mxu0 %v791_v22  ;;  %v1134_v21 = vld [vmem:[#allocation19 + $0x1b0] sm:$0xff]  ;;  %v1128_v22 = vld [vmem:[#allocation19 + $0x180] sm:$0xff] }
 0x148   :  { %889 = vmatprep.subr.mxu1 %v793_v23  ;;  %819 = vmatpush1.msra.mxu0 %v790_v24  ;;  %v1131_v23 = vld [vmem:[#allocation19 + $0x198] sm:$0xff]  ;;  %v1125_v24 = vld [vmem:[#allocation19 + $0x168] sm:$0xff] }
 0x149   :  { %890 = vmatpush1.msra.mxu1 %v792_v25  ;;  %820 = vmatprep.subr.mxu0 %v787_v26  ;;  %v1130_v25 = vld [vmem:[#allocation19 + $0x190] sm:$0xff]  ;;  %v1124_v26 = vld [vmem:[#allocation19 + $0x160] sm:$0xff] }
 0x14a   :  { %891 = vmatprep.subr.mxu1 %v789_v27  ;;  %821 = vmatpush1.msra.mxu0 %v786_v28  ;;  %v1127_v27 = vld [vmem:[#allocation19 + $0x178] sm:$0xff]  ;;  %v1121_v28 = vld [vmem:[#allocation19 + $0x148] sm:$0xff] }
 0x14b   :  { %892 = vmatpush1.msra.mxu1 %v788_v29  ;;  %822 = vmatprep.subr.mxu0 %v783_v30  ;;  %v1126_v29 = vld [vmem:[#allocation19 + $0x170] sm:$0xff]  ;;  %v1120_v30 = vld [vmem:[#allocation19 + $0x140] sm:$0xff] }
 0x14c   :  { %893 = vmatprep.subr.mxu1 %v785_v31  ;;  %823 = vmatpush1.msra.mxu0 %v782_v32  ;;  %v1123_v31 = vld [vmem:[#allocation19 + $0x158] sm:$0xff]  ;;  %v1117_v32 = vld [vmem:[#allocation19 + $0x128] sm:$0xff] }
 0x14d   :  { %894 = vmatpush1.msra.mxu1 %v784_v33  ;;  %824 = vmatprep.subr.mxu0 %v779_v34  ;;  %v1122_v33 = vld [vmem:[#allocation19 + $0x150] sm:$0xff]  ;;  %v1116_v34 = vld [vmem:[#allocation19 + $0x120] sm:$0xff] }
 0x14e   :  { %895 = vmatprep.subr.mxu1 %v781_v35  ;;  %825 = vmatpush1.msra.mxu0 %v778_v36  ;;  %v1119_v35 = vld [vmem:[#allocation19 + $0x138] sm:$0xff]  ;;  %v1113_v36 = vld [vmem:[#allocation19 + $0x108] sm:$0xff] }
 0x14f   :  { %896 = vmatpush1.msra.mxu1 %v780_v37  ;;  %826 = vmatprep.subr.mxu0 %v775_v38  ;;  %v1118_v37 = vld [vmem:[#allocation19 + $0x130] sm:$0xff]  ;;  %v1112_v38 = vld [vmem:[#allocation19 + $0x100] sm:$0xff] }
 0x150   :  { %897 = vmatprep.subr.mxu1 %v777_v39  ;;  %827 = vmatpush1.msra.mxu0 %v774_v40  ;;  %v1115_v39 = vld [vmem:[#allocation19 + $0x118] sm:$0xff]  ;;  %v1109_v40 = vld [vmem:[#allocation19 + $0xe8] sm:$0xff] }
 0x151   :  { %898 = vmatpush1.msra.mxu1 %v776_v41  ;;  %828 = vmatprep.subr.mxu0 %v771_v42  ;;  %v1114_v41 = vld [vmem:[#allocation19 + $0x110] sm:$0xff]  ;;  %v1108_v42 = vld [vmem:[#allocation19 + $0xe0] sm:$0xff] }
 0x152   :  { %899 = vmatprep.subr.mxu1 %v773_v43  ;;  %829 = vmatpush1.msra.mxu0 %v770_v44  ;;  %v1111_v43 = vld [vmem:[#allocation19 + $0xf8] sm:$0xff]  ;;  %v1105_v44 = vld [vmem:[#allocation19 + $0xc8] sm:$0xff] }
 0x153   :  { %900 = vmatpush1.msra.mxu1 %v772_v45  ;;  %830 = vmatprep.subr.mxu0 %v767_v46  ;;  %v1110_v45 = vld [vmem:[#allocation19 + $0xf0] sm:$0xff]  ;;  %v1104_v46 = vld [vmem:[#allocation19 + $0xc0] sm:$0xff] }
 0x154   :  { %901 = vmatprep.subr.mxu1 %v769_v47  ;;  %831 = vmatpush1.msra.mxu0 %v766_v48  ;;  %v1107_v47 = vld [vmem:[#allocation19 + $0xd8] sm:$0xff]  ;;  %v1101_v48 = vld [vmem:[#allocation19 + $0xa8] sm:$0xff] }
 0x155   :  { %902 = vmatpush1.msra.mxu1 %v768_v49  ;;  %832 = vmatprep.subr.mxu0 %v763_v50  ;;  %v1106_v49 = vld [vmem:[#allocation19 + $0xd0] sm:$0xff]  ;;  %v1100_v50 = vld [vmem:[#allocation19 + $0xa0] sm:$0xff] }
 0x156   :  { %903 = vmatprep.subr.mxu1 %v765_v51  ;;  %833 = vmatpush1.msra.mxu0 %v762_v52  ;;  %v1103_v51 = vld [vmem:[#allocation19 + $0xb8] sm:$0xff]  ;;  %v1097_v52 = vld [vmem:[#allocation19 + $0x88] sm:$0xff] }
 0x157   :  { %904 = vmatpush1.msra.mxu1 %v764_v53  ;;  %834 = vmatprep.subr.mxu0 %v759_v54  ;;  %v1102_v53 = vld [vmem:[#allocation19 + $0xb0] sm:$0xff]  ;;  %v1096_v54 = vld [vmem:[#allocation19 + $0x80] sm:$0xff] }
 0x158   :  { %905 = vmatprep.subr.mxu1 %v761_v55  ;;  %835 = vmatpush1.msra.mxu0 %v758_v56  ;;  %v1099_v55 = vld [vmem:[#allocation19 + $0x98] sm:$0xff]  ;;  %v1093_v56 = vld [vmem:[#allocation19 + $0x68] sm:$0xff] }
 0x159   :  { %906 = vmatpush1.msra.mxu1 %v760_v57  ;;  %836 = vmatprep.subr.mxu0 %v755_v58  ;;  %v1098_v57 = vld [vmem:[#allocation19 + $0x90] sm:$0xff]  ;;  %v1092_v58 = vld [vmem:[#allocation19 + $0x60] sm:$0xff] }
 0x15a   :  { %907 = vmatprep.subr.mxu1 %v757_v59  ;;  %837 = vmatpush1.msra.mxu0 %v754_v60  ;;  %v1095_v59 = vld [vmem:[#allocation19 + $0x78] sm:$0xff]  ;;  %v1089_v60 = vld [vmem:[#allocation19 + $0x48] sm:$0xff] }
 0x15b   :  { %908 = vmatpush1.msra.mxu1 %v756_v61  ;;  %838 = vmatprep.subr.mxu0 %v751_v62  ;;  %v1094_v61 = vld [vmem:[#allocation19 + $0x70] sm:$0xff]  ;;  %v1088_v62 = vld [vmem:[#allocation19 + $0x40] sm:$0xff] }
 0x15c   :  { %909 = vmatprep.subr.mxu1 %v753_v63  ;;  %839 = vmatpush1.msra.mxu0 %v750_v1  ;;  %v1091_v63 = vld [vmem:[#allocation19 + $0x58] sm:$0xff]  ;;  %v1085_v1 = vld [vmem:[#allocation19 + $0x28] sm:$0xff] }
 0x15d   :  { %910 = vmatpush1.msra.mxu1 %v752_v2  ;;  %840 = vmatprep.subr.mxu0 %v747_v3  ;;  %v1090_v2 = vld [vmem:[#allocation19 + $0x50] sm:$0xff]  ;;  %v1084_v3 = vld [vmem:[#allocation19 + $0x20] sm:$0xff] }
 0x15e   :  { %911 = vmatprep.subr.mxu1 %v749_v4  ;;  %841 = vmatpush1.msra.mxu0 %v746_v5  ;;  %v1087_v4 = vld [vmem:[#allocation19 + $0x38] sm:$0xff]  ;;  %v1081_v5 = vld [vmem:[#allocation19 + $0x8] sm:$0xff] }
 0x15f   :  { %874 = vmatprep.mubr.f32.mxu0 %v4475_v0  ;;  %912 = vmatpush1.msra.mxu1 %v748_v6  ;;  %v1086_v6 = vld [vmem:[#allocation19 + $0x30] sm:$0xff] }
 0x160   :  { %945 = vmatprep.mubr.f32.mxu1 %v4475_v0  ;;  %875 = vmatmul.mubr.f32.vlgmr.msra.gmra.mxu0 %v331_v7 }
 0x161   :  { %946 = vmatmul.mubr.f32.vlgmr.msra.gmra.mxu1 %v331_v7  ;;  %1010 = vperm.xlu0 %3873, %v329_v8   ;;  %v1080_v7 = vld [vmem:[#allocation19] sm:$0xff]  ;;  %v1083_v8 = vld [vmem:[#allocation19 + $0x18] sm:$0xff] }
 0x162   :  { %1208 = vmatprep.mubr.f32.mxu0 %v4475_v0  ;;  %1279 = vmatprep.mubr.f32.mxu1 %v4475_v0 }
 0x163   :  { %1144 = vmatprep.subr.mxu0 %v1141_v9  ;;  %1215 = vmatprep.subr.mxu1 %v1143_v11  ;;  %v1014_v9 = vld [vmem:[#allocation10] sm:$0xff]  ;;  %v1077_v11 = vld [vmem:[#allocation17 + $0x1e8] sm:$0xff] }
 0x164   :  { %1145 = vmatpush1.msra.mxu0 %v1140_v10  ;;  %1216 = vmatpush1.msra.mxu1 %v1142_v13  ;;  %v1082_v10 = vld [vmem:[#allocation19 + $0x10] sm:$0xff]  ;;  %v1076_v13 = vld [vmem:[#allocation17 + $0x1e0] sm:$0xff] }
 0x165   :  { %1146 = vmatprep.subr.mxu0 %v1137_v12  ;;  %1217 = vmatprep.subr.mxu1 %v1139_v15  ;;  %v1079_v12 = vld [vmem:[#allocation17 + $0x1f8] sm:$0xff]  ;;  %v1073_v15 = vld [vmem:[#allocation17 + $0x1c8] sm:$0xff] }
 0x166   :  { %1147 = vmatpush1.msra.mxu0 %v1136_v14  ;;  %1218 = vmatpush1.msra.mxu1 %v1138_v17  ;;  %v1078_v14 = vld [vmem:[#allocation17 + $0x1f0] sm:$0xff]  ;;  %v1072_v17 = vld [vmem:[#allocation17 + $0x1c0] sm:$0xff] }
 0x167   :  { %1148 = vmatprep.subr.mxu0 %v1133_v16  ;;  %1219 = vmatprep.subr.mxu1 %v1135_v19  ;;  %v1075_v16 = vld [vmem:[#allocation17 + $0x1d8] sm:$0xff]  ;;  %v1069_v19 = vld [vmem:[#allocation17 + $0x1a8] sm:$0xff] }
 0x168   :  { %1149 = vmatpush1.msra.mxu0 %v1132_v18  ;;  %1220 = vmatpush1.msra.mxu1 %v1134_v21  ;;  %v1074_v18 = vld [vmem:[#allocation17 + $0x1d0] sm:$0xff]  ;;  %v1068_v21 = vld [vmem:[#allocation17 + $0x1a0] sm:$0xff] }
 0x169   :  { %1150 = vmatprep.subr.mxu0 %v1129_v20  ;;  %1221 = vmatprep.subr.mxu1 %v1131_v23  ;;  %v1071_v20 = vld [vmem:[#allocation17 + $0x1b8] sm:$0xff]  ;;  %v1065_v23 = vld [vmem:[#allocation17 + $0x188] sm:$0xff] }
 0x16a   :  { %1151 = vmatpush1.msra.mxu0 %v1128_v22  ;;  %1222 = vmatpush1.msra.mxu1 %v1130_v25  ;;  %v1070_v22 = vld [vmem:[#allocation17 + $0x1b0] sm:$0xff]  ;;  %v1064_v25 = vld [vmem:[#allocation17 + $0x180] sm:$0xff] }
 0x16b   :  { %1152 = vmatprep.subr.mxu0 %v1125_v24  ;;  %1223 = vmatprep.subr.mxu1 %v1127_v27  ;;  %v1067_v24 = vld [vmem:[#allocation17 + $0x198] sm:$0xff]  ;;  %v1061_v27 = vld [vmem:[#allocation17 + $0x168] sm:$0xff] }
 0x16c   :  { %1153 = vmatpush1.msra.mxu0 %v1124_v26  ;;  %1224 = vmatpush1.msra.mxu1 %v1126_v29  ;;  %v1066_v26 = vld [vmem:[#allocation17 + $0x190] sm:$0xff]  ;;  %v1060_v29 = vld [vmem:[#allocation17 + $0x160] sm:$0xff] }
 0x16d   :  { %1154 = vmatprep.subr.mxu0 %v1121_v28  ;;  %1225 = vmatprep.subr.mxu1 %v1123_v31  ;;  %v1063_v28 = vld [vmem:[#allocation17 + $0x178] sm:$0xff]  ;;  %v1057_v31 = vld [vmem:[#allocation17 + $0x148] sm:$0xff] }
 0x16e   :  { %1155 = vmatpush1.msra.mxu0 %v1120_v30  ;;  %1226 = vmatpush1.msra.mxu1 %v1122_v33  ;;  %v1062_v30 = vld [vmem:[#allocation17 + $0x170] sm:$0xff]  ;;  %v1056_v33 = vld [vmem:[#allocation17 + $0x140] sm:$0xff] }
 0x16f   :  { %1156 = vmatprep.subr.mxu0 %v1117_v32  ;;  %1227 = vmatprep.subr.mxu1 %v1119_v35  ;;  %v1059_v32 = vld [vmem:[#allocation17 + $0x158] sm:$0xff]  ;;  %v1053_v35 = vld [vmem:[#allocation17 + $0x128] sm:$0xff] }
 0x170   :  { %1157 = vmatpush1.msra.mxu0 %v1116_v34  ;;  %1228 = vmatpush1.msra.mxu1 %v1118_v37  ;;  %v1058_v34 = vld [vmem:[#allocation17 + $0x150] sm:$0xff]  ;;  %v1052_v37 = vld [vmem:[#allocation17 + $0x120] sm:$0xff] }
 0x171   :  { %1158 = vmatprep.subr.mxu0 %v1113_v36  ;;  %1229 = vmatprep.subr.mxu1 %v1115_v39  ;;  %v1055_v36 = vld [vmem:[#allocation17 + $0x138] sm:$0xff]  ;;  %v1049_v39 = vld [vmem:[#allocation17 + $0x108] sm:$0xff] }
 0x172   :  { %1159 = vmatpush1.msra.mxu0 %v1112_v38  ;;  %1230 = vmatpush1.msra.mxu1 %v1114_v41  ;;  %v1054_v38 = vld [vmem:[#allocation17 + $0x130] sm:$0xff]  ;;  %v1048_v41 = vld [vmem:[#allocation17 + $0x100] sm:$0xff] }
 0x173   :  { %1160 = vmatprep.subr.mxu0 %v1109_v40  ;;  %1231 = vmatprep.subr.mxu1 %v1111_v43  ;;  %v1051_v40 = vld [vmem:[#allocation17 + $0x118] sm:$0xff]  ;;  %v1045_v43 = vld [vmem:[#allocation17 + $0xe8] sm:$0xff] }
 0x174   :  { %1161 = vmatpush1.msra.mxu0 %v1108_v42  ;;  %1232 = vmatpush1.msra.mxu1 %v1110_v45  ;;  %v1050_v42 = vld [vmem:[#allocation17 + $0x110] sm:$0xff]  ;;  %v1044_v45 = vld [vmem:[#allocation17 + $0xe0] sm:$0xff] }
 0x175   :  { %1162 = vmatprep.subr.mxu0 %v1105_v44  ;;  %1233 = vmatprep.subr.mxu1 %v1107_v47  ;;  %v1047_v44 = vld [vmem:[#allocation17 + $0xf8] sm:$0xff]  ;;  %v1041_v47 = vld [vmem:[#allocation17 + $0xc8] sm:$0xff] }
 0x176   :  { %1163 = vmatpush1.msra.mxu0 %v1104_v46  ;;  %1234 = vmatpush1.msra.mxu1 %v1106_v49  ;;  %v1046_v46 = vld [vmem:[#allocation17 + $0xf0] sm:$0xff]  ;;  %v1040_v49 = vld [vmem:[#allocation17 + $0xc0] sm:$0xff] }
 0x177   :  { %1164 = vmatprep.subr.mxu0 %v1101_v48  ;;  %1235 = vmatprep.subr.mxu1 %v1103_v51  ;;  %v1043_v48 = vld [vmem:[#allocation17 + $0xd8] sm:$0xff]  ;;  %v1037_v51 = vld [vmem:[#allocation17 + $0xa8] sm:$0xff] }
 0x178   :  { %1165 = vmatpush1.msra.mxu0 %v1100_v50  ;;  %1236 = vmatpush1.msra.mxu1 %v1102_v53  ;;  %v1042_v50 = vld [vmem:[#allocation17 + $0xd0] sm:$0xff]  ;;  %v1036_v53 = vld [vmem:[#allocation17 + $0xa0] sm:$0xff] }
 0x179   :  { %1166 = vmatprep.subr.mxu0 %v1097_v52  ;;  %1237 = vmatprep.subr.mxu1 %v1099_v55  ;;  %v1039_v52 = vld [vmem:[#allocation17 + $0xb8] sm:$0xff]  ;;  %v1033_v55 = vld [vmem:[#allocation17 + $0x88] sm:$0xff] }
 0x17a   :  { %1167 = vmatpush1.msra.mxu0 %v1096_v54  ;;  %1238 = vmatpush1.msra.mxu1 %v1098_v57  ;;  %v1038_v54 = vld [vmem:[#allocation17 + $0xb0] sm:$0xff]  ;;  %v1032_v57 = vld [vmem:[#allocation17 + $0x80] sm:$0xff] }
 0x17b   :  { %1168 = vmatprep.subr.mxu0 %v1093_v56  ;;  %1239 = vmatprep.subr.mxu1 %v1095_v59  ;;  %v1035_v56 = vld [vmem:[#allocation17 + $0x98] sm:$0xff]  ;;  %v1029_v59 = vld [vmem:[#allocation17 + $0x68] sm:$0xff] }
 0x17c   :  { %1169 = vmatpush1.msra.mxu0 %v1092_v58  ;;  %1240 = vmatpush1.msra.mxu1 %v1094_v61  ;;  %v1034_v58 = vld [vmem:[#allocation17 + $0x90] sm:$0xff]  ;;  %v1028_v61 = vld [vmem:[#allocation17 + $0x60] sm:$0xff] }
 0x17d   :  { %1170 = vmatprep.subr.mxu0 %v1089_v60  ;;  %1241 = vmatprep.subr.mxu1 %v1091_v63  ;;  %v1031_v60 = vld [vmem:[#allocation17 + $0x78] sm:$0xff]  ;;  %v1025_v63 = vld [vmem:[#allocation17 + $0x48] sm:$0xff] }
 0x17e   :  { %1171 = vmatpush1.msra.mxu0 %v1088_v62  ;;  %1242 = vmatpush1.msra.mxu1 %v1090_v2  ;;  %v1030_v62 = vld [vmem:[#allocation17 + $0x70] sm:$0xff]  ;;  %v1024_v2 = vld [vmem:[#allocation17 + $0x40] sm:$0xff] }
 0x17f   :  { %1172 = vmatprep.subr.mxu0 %v1085_v1  ;;  %1243 = vmatprep.subr.mxu1 %v1087_v4  ;;  %v1027_v1 = vld [vmem:[#allocation17 + $0x58] sm:$0xff]  ;;  %v1021_v4 = vld [vmem:[#allocation17 + $0x28] sm:$0xff] }
 0x180   :  { %1173 = vmatpush1.msra.mxu0 %v1084_v3  ;;  %1244 = vmatpush1.msra.mxu1 %v1086_v6  ;;  %v1026_v3 = vld [vmem:[#allocation17 + $0x50] sm:$0xff]  ;;  %v1020_v6 = vld [vmem:[#allocation17 + $0x20] sm:$0xff] }
 0x181   :  { %1174 = vmatprep.subr.mxu0 %v1081_v5  ;;  %1245 = vmatprep.subr.mxu1 %v1083_v8  ;;  %v1023_v5 = vld [vmem:[#allocation17 + $0x38] sm:$0xff]  ;;  %v1017_v8 = vld [vmem:[#allocation17 + $0x8] sm:$0xff] }
 0x182   :  { %1175 = vmatpush1.msra.mxu0 %v1080_v7  ;;  %1246 = vmatpush1.msra.mxu1 %v1082_v10  ;;  %v1022_v7 = vld [vmem:[#allocation17 + $0x30] sm:$0xff]  ;;  %v1016_v10 = vld [vmem:[#allocation17] sm:$0xff] }
 0x183   :  { %1209 = vmatmul.mubr.f32.vlgmr.msra.gmra.mxu0 %v1014_v9  ;;  %1286 = vmatprep.subr.mxu0 %v1077_v11  ;;  %v1018_v11 = vld [vmem:[#allocation17 + $0x10] sm:$0xff] }
 0x184   :  { %1357 = vmatprep.subr.mxu1 %v1079_v12  ;;  %1280 = vmatmul.mubr.f32.vlgmr.msra.gmra.mxu1 %v1014_v9  ;;  %v1019_v9 = vld [vmem:[#allocation17 + $0x18] sm:$0xff]  ;;  %v958_v12 = vlaneseq }
 0x185   :  { %1287 = vmatpush1.msra.mxu0 %v1076_v13  ;;  %1358 = vmatpush1.msra.mxu1 %v1078_v14 }
 0x186   :  { %1288 = vmatprep.subr.mxu0 %v1073_v15  ;;  %1359 = vmatprep.subr.mxu1 %v1075_v16  ;;  %v4716_v15 = vshrl.u32 %v958_v12, 7  ;;  %v1498_v12 = vld [vmem:[#allocation20 + $0x40] sm:$0xff] }
 0x187   :  { %1289 = vmatpush1.msra.mxu0 %v1072_v17  ;;  %1360 = vmatpush1.msra.mxu1 %v1074_v18 }
 0x188   :  { %1290 = vmatprep.subr.mxu0 %v1069_v19  ;;  %1361 = vmatprep.subr.mxu1 %v1071_v20  ;;  %v960_v19 = vsub.s32 0, %v4716_v15  ;;  %v956_v20 = vld [vmem:[%s4984_s27] sm:$0xf] }
 0x189   :  { %1291 = vmatpush1.msra.mxu0 %v1068_v21  ;;  %1362 = vmatpush1.msra.mxu1 %v1070_v22  ;;  %v964_v22 = vsub.s32 1, %v4716_v15 }
 0x18a   :  { %1292 = vmatprep.subr.mxu0 %v1065_v23  ;;  %1363 = vmatprep.subr.mxu1 %v1067_v24 }
 0x18b   :  { %1293 = vmatpush1.msra.mxu0 %v1064_v25  ;;  %1364 = vmatpush1.msra.mxu1 %v1066_v26  ;;  %v961_v25 = vrot.slane %v956_v20, %v960_v19 }
 0x18c   :  { %1294 = vmatprep.subr.mxu0 %v1061_v27  ;;  %1365 = vmatprep.subr.mxu1 %v1063_v28 }
 0x18d   :  { %1295 = vmatpush1.msra.mxu0 %v1060_v29  ;;  %1366 = vmatpush1.msra.mxu1 %v1062_v30  ;;  %v965_v30 = vrot.slane %v956_v20, %v964_v22 }
 0x18e   :  { %1296 = vmatprep.subr.mxu0 %v1057_v31  ;;  %1367 = vmatprep.subr.mxu1 %v1059_v32 }
 0x18f   :  { %1297 = vmatpush1.msra.mxu0 %v1056_v33  ;;  %1368 = vmatpush1.msra.mxu1 %v1058_v34 }
 0x190   :  { %1298 = vmatprep.subr.mxu0 %v1053_v35  ;;  %1369 = vmatprep.subr.mxu1 %v1055_v36 }
 0x191   :  { %1299 = vmatpush1.msra.mxu0 %v1052_v37  ;;  %1370 = vmatpush1.msra.mxu1 %v1054_v38  ;;  %v972_v37 = vsub.s32 3, %v4716_v15 }
 0x192   :  { %1300 = vmatprep.subr.mxu0 %v1049_v39  ;;  %1371 = vmatprep.subr.mxu1 %v1051_v40 }
 0x193   :  { %1301 = vmatpush1.msra.mxu0 %v1048_v41  ;;  %1372 = vmatpush1.msra.mxu1 %v1050_v42  ;;  %v973_v42 = vrot.slane %v956_v20, %v972_v37 }
 0x194   :  { %1302 = vmatprep.subr.mxu0 %v1045_v43  ;;  %1373 = vmatprep.subr.mxu1 %v1047_v44  ;;  %v968_v43 = vsub.s32 2, %v4716_v15 }
 0x195   :  { %1303 = vmatpush1.msra.mxu0 %v1044_v45  ;;  %1374 = vmatpush1.msra.mxu1 %v1046_v46 }
 0x196   :  { %1304 = vmatprep.subr.mxu0 %v1041_v47  ;;  %1375 = vmatprep.subr.mxu1 %v1043_v48  ;;  %v969_v47 = vrot.slane %v956_v20, %v968_v43  ;;  %v1492_v20 = vld [vmem:[#allocation20 + $0x10] sm:$0xff] }
 0x197   :  { %1305 = vmatpush1.msra.mxu0 %v1040_v49  ;;  %1376 = vmatpush1.msra.mxu1 %v1042_v50 }
 0x198   :  { %1306 = vmatprep.subr.mxu0 %v1037_v51  ;;  %1377 = vmatprep.subr.mxu1 %v1039_v52 }
 0x199   :  { %1307 = vmatpush1.msra.mxu0 %v1036_v53  ;;  %1378 = vmatpush1.msra.mxu1 %v1038_v54 }
 0x19a   :  { %1308 = vmatprep.subr.mxu0 %v1033_v55  ;;  %1379 = vmatprep.subr.mxu1 %v1035_v56  ;;  %v332_v56 = vld [vmem:[#allocation8] sm:$0xff] }
 0x19b   :  { %1309 = vmatpush1.msra.mxu0 %v1032_v57  ;;  %1380 = vmatpush1.msra.mxu1 %v1034_v58 }
 0x19c   :  { %1310 = vmatprep.subr.mxu0 %v1029_v59  ;;  %1381 = vmatprep.subr.mxu1 %v1031_v60 }
 0x19d   :  { %1311 = vmatpush1.msra.mxu0 %v1028_v61  ;;  %1382 = vmatpush1.msra.mxu1 %v1030_v62 }
 0x19e   :  { %1312 = vmatprep.subr.mxu0 %v1025_v63  ;;  %1383 = vmatprep.subr.mxu1 %v1027_v1 }
 0x19f   :  { %1313 = vmatpush1.msra.mxu0 %v1024_v2  ;;  %1384 = vmatpush1.msra.mxu1 %v1026_v3 }
 0x1a0   :  { %1314 = vmatprep.subr.mxu0 %v1021_v4  ;;  %1385 = vmatprep.subr.mxu1 %v1023_v5  ;;  %v1505_v5 = vld [vmem:[#allocation20 + $0x78] sm:$0xff] }
 0x1a1   :  { %1315 = vmatpush1.msra.mxu0 %v1020_v6  ;;  %1386 = vmatpush1.msra.mxu1 %v1022_v7  ;;  %v1504_v6 = vld [vmem:[#allocation20 + $0x70] sm:$0xff]  ;;  %v1503_v7 = vld [vmem:[#allocation20 + $0x68] sm:$0xff] }
 0x1a2   :  { %1316 = vmatprep.subr.mxu0 %v1017_v8  ;;  %1387 = vmatprep.subr.mxu1 %v1019_v9  ;;  %v1502_v8 = vld [vmem:[#allocation20 + $0x60] sm:$0xff]  ;;  %v1501_v9 = vld [vmem:[#allocation20 + $0x58] sm:$0xff] }
 0x1a3   :  { %1317 = vmatpush1.msra.mxu0 %v1016_v10  ;;  %1350 = vmatprep.mubr.f32.mxu0 %v4475_v0  ;;  %v1500_v10 = vld [vmem:[#allocation20 + $0x50] sm:$0xff] }
 0x1a4   :  { %1388 = vmatpush1.msra.mxu1 %v1018_v11  ;;  %1421 = vmatprep.mubr.f32.mxu1 %v4475_v0  ;;  %v1499_v11 = vld [vmem:[#allocation20 + $0x48] sm:$0xff] }
 0x1a5   :  { %3555 = vmatprep.subr.mxu0 %v4475_v0  ;;  %3590 = vmatprep.subr.mxu1 %v4475_v0 }
 0x1dc   :  { %v528_v13 = vpop.f32.mrf.mxu0  ;;  %v4731_v2 = vpop.permute.xlu0 %1010 }
 0x1de   :  { %v599_v14 = vpop.f32.mrf.mxu1  ;;  %v530_v16 = vpop.f32.mrf.mxu0 }
 0x1e0   :  { %v601_v18 = vpop.f32.mrf.mxu1 }
 0x1fe   :  { %v670_v17 = vpop.f32.mrf.mxu0 }
 0x1ff   :  { %v741_v21 = vpop.f32.mrf.mxu1  ;;  %v671_v24 = vadd.f32 %v670_v17, %v528_v13  ;;  %v1497_v13 = vld [vmem:[#allocation20 + $0x38] sm:$0xff]  ;;  %v1494_v17 = vld [vmem:[#allocation20 + $0x20] sm:$0xff] }
 0x200   :  { %v672_v23 = vpop.f32.mrf.mxu0  ;;  %v742_v44 = vadd.f32 %v741_v21, %v599_v14  ;;  %v1496_v14 = vld [vmem:[#allocation20 + $0x30] sm:$0xff]  ;;  %v1491_v21 = vld [vmem:[#allocation20 + $0x8] sm:$0xff] }
 0x201   :  { %v673_v27 = vadd.f32 %v672_v23, %v530_v16  ;;  %v743_v28 = vpop.f32.mrf.mxu1  ;;  %v1495_v16 = vld [vmem:[#allocation20 + $0x28] sm:$0xff]  ;;  %v1490_v23 = vld [vmem:[#allocation20] sm:$0xff] }
 0x202   :  { %v744_v40 = vadd.f32 %v743_v28, %v601_v18  ;;  %v1493_v18 = vld [vmem:[#allocation20 + $0x18] sm:$0xff] }
 0x220   :  { %v876_v26 = vpop.f32.mrf.mxu0 }
 0x221   :  { %v952_v29 = vadd.f32 %v876_v26, %v671_v24  ;;  %v947_v33 = vpop.f32.mrf.mxu1 }
 0x222   :  { %v878_v31 = vpop.f32.mrf.mxu0  ;;  %v954_v46 = vadd.f32 %v947_v33, %v742_v44 }
 0x223   :  { %v978_v32 = vadd.f32 %v961_v25, %v952_v29  ;;  %v953_v34 = vadd.f32 %v878_v31, %v673_v27  ;;  %v949_v39 = vpop.f32.mrf.mxu1  ;;  %v1428_v25 = vld [vmem:[%s4985_s30] sm:$0xf] }
 0x224   :  { %v955_v41 = vadd.f32 %v949_v39, %v744_v40  ;;  %v980_v50 = vadd.f32 %v969_v47, %v954_v46  ;;  %v1433_v28 = vrot.slane %v1428_v25, %v960_v19  ;;  %v1445_v19 = vrot.slane %v1428_v25, %v972_v37 }
 0x225   :  { %v3420_v35 = vmul.f32 -1.442695, %v978_v32  ;;  %v979_v36 = vadd.f32 %v965_v30, %v953_v34  ;;  %v1437_v32 = vrot.slane %v1428_v25, %v964_v22  ;;  %v1441_v46 = vrot.slane %v1428_v25, %v968_v43 }
 0x226   :  { %v981_v45 = vadd.f32 %v973_v42, %v955_v41 }
 0x227   :  { %3874 = vpow2.f32 %v3420_v35  ;;  %v3421_v38 = vmul.f32 -1.442695, %v979_v36 }
 0x228   :  { %v3422_v48 = vmul.f32 -1.442695, %v981_v45 }
 0x229   :  { %3876 = vpow2.f32 %v3421_v38 }
 0x22a   :  { %3878 = vpow2.f32 %v3422_v48 }
 0x234   :  { %v3875_v49 = vpop.eup %3874 }
 0x235   :  { %v985_v51 = vadd.f32 1.0, %v3875_v49 }
 0x236   :  { %v3877_v52 = vpop.eup %3876 }
 0x237   :  { %3880 = vrcp.f32 %v985_v51  ;;  %v991_v53 = vadd.f32 1.0, %v3877_v52  ;;  %v3879_v54 = vpop.eup %3878 }
 0x238   :  { %3882 = vtanh.f32 %v980_v50  ;;  %v998_v59 = vadd.f32 1.0, %v3879_v54  ;;  %v1015_v54 = vld [vmem:[#allocation11] sm:$0xff] }
 0x239   :  { %3884 = vrcp.f32 %v991_v53 }
 0x23a   :  { %3886 = vrcp.f32 %v998_v59 }
 0x243   :  { %v1210_v24 = vpop.f32.mrf.mxu0 }
 0x244   :  { %v3881_v55 = vpop.eup %3880  ;;  %v1281_v26 = vpop.f32.mrf.mxu1 }
 0x245   :  { %v3883_v57 = vpop.eup %3882  ;;  %v1212_v27 = vpop.f32.mrf.mxu0 }
 0x246   :  { %v3885_v58 = vpop.eup %3884  ;;  %v1002_v60 = vmul.f32 %v3883_v57, %v3881_v55  ;;  %v1283_v30 = vpop.f32.mrf.mxu1 }
 0x247   :  { %v1001_v61 = vmul.f32 %v3885_v58, %v332_v56  ;;  %v3887_v63 = vpop.eup %3886 }
 0x249   :  { %v1003_v62 = vadd.f32 %v1002_v60, %v1001_v61 }
 0x24b   :  { %3888 = vtanh.f32 %v1003_v62  ;;  %1007 = vst [vmem:[#allocation35] sm:$0xff] %v1003_v62 }
 0x258   :  { %v3889_v1 = vpop.eup %3888 }
 0x259   :  { %v1005_v3 = vmul.f32 %v3889_v1, %v3887_v63  ;;  %v1481_v63 = vld [vmem:[#allocation5] sm:$0xff]  ;;  %v4478_v1 = vmov 1966171168  }
 0x25b   :  { %v1013_v4 = vmul.f32 %v4731_v2, %v1005_v3  ;;  %1006 = vst [vmem:[#allocation34] sm:$0xff] %v1005_v3  ;;  %v1579_v3 = vunpack.c.l.s4 %v4478_v1 }
 0x25d   :  { %1351 = vmatmul.mubr.f32.vlgmr.msra.gmra.mxu0 %v1013_v4  ;;  %1422 = vmatmul.mubr.f32.vlgmr.msra.gmra.mxu1 %v1013_v4  ;;  %v1580_v4 = vunpack.c.0.s8 %v1579_v3 }
 0x25e   :  { %3556 = vmatpush3.msra.mxu0 %v1505_v5  ;;  %3587 = vmatprep.mubr.msk.f32.mxu0 %vm4477_vm0, %v4475_v0 }
 0x25f   :  { %3557 = vmatprep.subr.mxu0 %v4475_v0  ;;  %3592 = vmatprep.mubr.msk.f32.mxu1 %vm4477_vm0, %v4475_v0  ;;  %v4772_v5 = vsub.s32 %v1580_v4, %v4716_v15 }
 0x260   :  { %3558 = vmatpush3.msra.mxu0 %v1504_v6  ;;  %3591 = vmatpush3.xpose.msra.mxu1 %v1481_v63 }
 0x261   :  { %3559 = vmatprep.subr.mxu0 %v4475_v0  ;;  %3595 = vmatprep.subr.mxu1 %v4475_v0 }
 0x262   :  { %3560 = vmatpush3.msra.mxu0 %v1503_v7 }
 0x263   :  { %3561 = vmatprep.subr.mxu0 %v4475_v0 }
 0x264   :  { %3562 = vmatpush3.msra.mxu0 %v1502_v8 }
 0x265   :  { %3563 = vmatprep.subr.mxu0 %v4475_v0 }
 0x266   :  { %3564 = vmatpush3.msra.mxu0 %v1501_v9 }
 0x267   :  { %3565 = vmatprep.subr.mxu0 %v4475_v0 }
 0x268   :  { %3566 = vmatpush3.msra.mxu0 %v1500_v10 }
 0x269   :  { %3567 = vmatprep.subr.mxu0 %v4475_v0 }
 0x26a   :  { %3568 = vmatpush3.msra.mxu0 %v1499_v11  ;;  %v1482_v11 = vld [vmem:[#allocation5 + $0x8] sm:$0xff] }
 0x26b   :  { %3569 = vmatprep.subr.mxu0 %v4475_v0 }
 0x26c   :  { %3570 = vmatpush3.msra.mxu0 %v1498_v12 }
 0x26d   :  { %3571 = vmatprep.subr.mxu0 %v4475_v0 }
 0x26e   :  { %3572 = vmatpush3.msra.mxu0 %v1497_v13  ;;  %v4780_v13 = vld [vmem:[#allocation5 + $0x10] sm:$0xff] }
 0x26f   :  { %3573 = vmatprep.subr.mxu0 %v4475_v0 }
 0x270   :  { %3574 = vmatpush3.msra.mxu0 %v1496_v14 }
 0x271   :  { %3575 = vmatprep.subr.mxu0 %v4475_v0 }
 0x272   :  { %3576 = vmatpush3.msra.mxu0 %v1495_v16  ;;  %v4786_v16 = vld [vmem:[#allocation5 + $0x18] sm:$0xff] }
 0x273   :  { %3577 = vmatprep.subr.mxu0 %v4475_v0 }
 0x274   :  { %3578 = vmatpush3.msra.mxu0 %v1494_v17 }
 0x275   :  { %3579 = vmatprep.subr.mxu0 %v4475_v0 }
 0x276   :  { %3580 = vmatpush3.msra.mxu0 %v1493_v18 }
 0x277   :  { %3581 = vmatprep.subr.mxu0 %v4475_v0 }
 0x278   :  { %3582 = vmatpush3.msra.mxu0 %v1492_v20  ;;  %v4793_v20 = vld [vmem:[#allocation5 + $0x20] sm:$0xff] }
 0x279   :  { %3583 = vmatprep.subr.mxu0 %v4475_v0 }
 0x27a   :  { %3584 = vmatpush3.msra.mxu0 %v1491_v21 }
 0x27b   :  { %3585 = vmatprep.subr.mxu0 %v4475_v0 }
 0x27c   :  { %3586 = vmatpush3.msra.mxu0 %v1490_v23 }
 0x27d   :  { %3630 = vmatprep.subr.mxu0 %v4475_v0 }
 0x31d   :  { %v1352_v29 = vpop.f32.mrf.mxu0  ;;  %v1423_v35 = vpop.f32.mrf.mxu1 }
 0x31e   :  { %v1353_v31 = vadd.f32 %v1352_v29, %v1210_v24  ;;  %v1424_v45 = vadd.f32 %v1423_v35, %v1281_v26  ;;  %v4800_v24 = vld [vmem:[#allocation5 + $0x28] sm:$0xff]  ;;  %v4807_v26 = vld [vmem:[#allocation5 + $0x30] sm:$0xff] }
 0x31f   :  { %v1354_v33 = vpop.f32.mrf.mxu0  ;;  %v1425_v41 = vpop.f32.mrf.mxu1 }
 0x320   :  { %v1450_v34 = vadd.f32 %v1433_v28, %v1353_v31  ;;  %v1355_v36 = vadd.f32 %v1354_v33, %v1212_v27  ;;  %v1426_v42 = vadd.f32 %v1425_v41, %v1283_v30  ;;  %v1452_v48 = vadd.f32 %v1441_v46, %v1424_v45  ;;  %v4813_v28 = vld [vmem:[#allocation5 + $0x38] sm:$0xff] }
 0x322   :  { %v3423_v38 = vmul.f32 -1.442695, %v1450_v34  ;;  %v1451_v39 = vadd.f32 %v1437_v32, %v1355_v36  ;;  %v1453_v44 = vadd.f32 %v1445_v19, %v1426_v42 }
 0x324   :  { %3890 = vpow2.f32 %v3423_v38  ;;  %v3424_v40 = vmul.f32 -1.442695, %v1451_v39  ;;  %v3425_v22 = vmul.f32 -1.442695, %v1453_v44 }
 0x326   :  { %3892 = vpow2.f32 %v3424_v40 }
 0x327   :  { %3894 = vpow2.f32 %v3425_v22 }
 0x331   :  { %v3891_v47 = vpop.eup %3890 }
 0x332   :  { %v1457_v49 = vadd.f32 1.0, %v3891_v47 }
 0x333   :  { %v3893_v50 = vpop.eup %3892 }
 0x334   :  { %3896 = vrcp.f32 %v1457_v49  ;;  %v1463_v51 = vadd.f32 1.0, %v3893_v50  ;;  %v3895_v52 = vpop.eup %3894 }
 0x335   :  { %3898 = vtanh.f32 %v1452_v48  ;;  %v1470_v56 = vadd.f32 1.0, %v3895_v52  ;;  %v1489_v52 = vld [vmem:[#allocation7] sm:$0xff] }
 0x336   :  { %3900 = vrcp.f32 %v1463_v51  ;;  %vm2194_vm8 = vcmp.gt.f32.partialorder %v1489_v52, 0.0 }
 0x337   :  { %3902 = vrcp.f32 %v1470_v56 }
 0x341   :  { %v3897_v53 = vpop.eup %3896 }
 0x342   :  { %v3899_v55 = vpop.eup %3898 }
 0x343   :  { %v3901_v37 = vpop.eup %3900  ;;  %v1474_v57 = vmul.f32 %v3899_v55, %v3897_v53 }
 0x344   :  { %v1473_v58 = vmul.f32 %v3901_v37, %v1015_v54  ;;  %v3903_v43 = vpop.eup %3902 }
 0x346   :  { %v1475_v59 = vadd.f32 %v1474_v57, %v1473_v58 }
 0x348   :  { %1479 = vst [vmem:[#allocation38] sm:$0xff] %v1475_v59  ;;  %3904 = vtanh.f32 %v1475_v59 }
 0x355   :  { %v3905_v60 = vpop.eup %3904 }
 0x356   :  { %v1477_v61 = vmul.f32 %v3905_v60, %v3903_v43 }
 0x358   :  { %v4764_v62 = vmul.f32 %v1477_v61, %v4731_v2  ;;  %1478 = vst [vmem:[#allocation37] sm:$0xff] %v1477_v61 }
 0x35a   :  { %3588 = vmatmul.mubr.f32.vlgmr.msra.gmra.mxu0 %v4764_v62 }
 0x35b   :  { %3632 = vmatprep.mubr.msk.f32.mxu0 %vm4477_vm0, %v4475_v0  ;;  %3631 = vmatpush3.msra.mxu0 %v1481_v63 }
 0x35c   :  { %3640 = vmatprep.subr.mxu0 %v4475_v0 }
 0x41a   :  { %v1572_v6 = vpop.f32.mrf.mxu0 }
 0x41b   :  { %v1584_v7 = vrot.slane %v1572_v6, %v4772_v5  ;;  %v1577_v15 = vcombine.high %v1572_v6, %v1572_v6 }
 0x41c   :  { %v3589_v8 = vpop.f32.mrf.mxu0 }
 0x41d   :  { %v1592_v9 = vcombine.high %v1584_v7, %v1584_v7  ;;  %v1600_v10 = vrot.slane %v1584_v7, %v4772_v5  ;;  %v1591_v17 = vrot.slane %v1577_v15, %v4772_v5 }
 0x41f   :  { %3593 = vmatmul.mubr.f32.vlgmr.msra.gmra.mxu1 %v1600_v10  ;;  %v1614_v12 = vrot.slane %v1592_v9, %v4772_v5  ;;  %v1622_v14 = vcombine.high %v1600_v10, %v1600_v10  ;;  %v1593_v21 = vcombine.high %v1591_v17, %v1591_v17  ;;  %v1607_v23 = vrot.slane %v1591_v17, %v4772_v5 }
 0x420   :  { %3596 = vmatpush3.xpose.msra.mxu1 %v1482_v11  ;;  %3597 = vmatprep.mubr.msk.f32.mxu1 %vm4477_vm0, %v4475_v0 }
 0x421   :  { %3600 = vmatprep.subr.mxu1 %v4475_v0  ;;  %v1624_v18 = vcombine.high %v1614_v12, %v1614_v12  ;;  %v1621_v25 = vrot.slane %v1593_v21, %v4772_v5  ;;  %v1623_v27 = vcombine.high %v1607_v23, %v1607_v23 }
 0x423   :  { %3598 = vmatmul.mubr.f32.vlgmr.msra.gmra.mxu1 %v1614_v12  ;;  %v1625_v29 = vcombine.high %v1621_v25, %v1621_v25 }
 0x424   :  { %3601 = vmatpush3.xpose.msra.mxu1 %v4780_v13  ;;  %3602 = vmatprep.mubr.msk.f32.mxu1 %vm4477_vm0, %v4475_v0 }
 0x425   :  { %3605 = vmatprep.subr.mxu1 %v4475_v0 }
 0x427   :  { %3603 = vmatmul.mubr.f32.vlgmr.msra.gmra.mxu1 %v1622_v14 }
 0x428   :  { %3606 = vmatpush3.xpose.msra.mxu1 %v4786_v16  ;;  %3607 = vmatprep.mubr.msk.f32.mxu1 %vm4477_vm0, %v4475_v0 }
 0x429   :  { %3610 = vmatprep.subr.mxu1 %v4475_v0 }
 0x42b   :  { %3608 = vmatmul.mubr.f32.vlgmr.msra.gmra.mxu1 %v1624_v18 }
 0x42c   :  { %3611 = vmatpush3.xpose.msra.mxu1 %v4793_v20  ;;  %3612 = vmatprep.mubr.msk.f32.mxu1 %vm4477_vm0, %v4475_v0 }
 0x42d   :  { %3615 = vmatprep.subr.mxu1 %v4475_v0 }
 0x42f   :  { %3613 = vmatmul.mubr.f32.vlgmr.msra.gmra.mxu1 %v1607_v23 }
 0x430   :  { %3616 = vmatpush3.xpose.msra.mxu1 %v4800_v24  ;;  %3617 = vmatprep.mubr.msk.f32.mxu1 %vm4477_vm0, %v4475_v0 }
 0x431   :  { %3620 = vmatprep.subr.mxu1 %v4475_v0 }
 0x433   :  { %3618 = vmatmul.mubr.f32.vlgmr.msra.gmra.mxu1 %v1621_v25 }
 0x434   :  { %3621 = vmatpush3.xpose.msra.mxu1 %v4807_v26  ;;  %3622 = vmatprep.mubr.msk.f32.mxu1 %vm4477_vm0, %v4475_v0 }
 0x435   :  { %3625 = vmatprep.subr.mxu1 %v4475_v0 }
 0x437   :  { %3623 = vmatmul.mubr.f32.vlgmr.msra.gmra.mxu1 %v1623_v27 }
 0x438   :  { %3626 = vmatpush3.xpose.msra.mxu1 %v4813_v28  ;;  %3627 = vmatprep.mubr.msk.f32.mxu1 %vm4477_vm0, %v4475_v0 }
 0x439   :  { %3635 = vmatprep.subr.mxu1 %v4475_v0 }
 0x43b   :  { %3628 = vmatmul.mubr.f32.vlgmr.msra.gmra.mxu1 %v1625_v29  ;;  %v2920_v29 = vld [vmem:[#allocation23 + $0x68] sm:$0xff] }
 0x43c   :  { %3636 = vmatpush3.msra.mxu1 %v1482_v11  ;;  %3637 = vmatprep.mubr.msk.f32.mxu1 %vm4477_vm0, %v4475_v0 }
 0x43d   :  { %3645 = vmatprep.subr.mxu1 %v4475_v0 }
 0x4df   :  { %v1700_v30 = vpop.f32.mrf.mxu1 }
 0x4e1   :  { %v3594_v31 = vpop.f32.mrf.mxu1 }
 0x4e2   :  { %v2904_v31 = vld [vmem:[#allocation22 + $0x68] sm:$0xff] }
 0x4e3   :  { %v1770_v32 = vpop.f32.mrf.mxu1 }
 0x4e4   :  { %v2203_v42 = vrot.slane %v1770_v32, 7  ;;  %v2918_v32 = vld [vmem:[#allocation23 + $0x58] sm:$0xff] }
 0x4e5   :  { %v3599_v33 = vpop.f32.mrf.mxu1 }
 0x4e6   :  { %v2205_v47 = vsel %vm2204_vm1, %v2203_v42, %v1700_v30  ;;  %v2919_v30 = vld [vmem:[#allocation23 + $0x60] sm:$0xff]  ;;  %v2913_v42 = vld [vmem:[#allocation23 + $0x30] sm:$0xff] }
 0x4e7   :  { %v1840_v34 = vpop.f32.mrf.mxu1  ;;  %v2903_v33 = vld [vmem:[#allocation22 + $0x60] sm:$0xff] }
 0x4e8   :  { %v2206_v19 = vrot.slane %v1840_v34, 6  ;;  %v2917_v34 = vld [vmem:[#allocation23 + $0x50] sm:$0xff] }
 0x4e9   :  { %v3604_v35 = vpop.f32.mrf.mxu1 }
 0x4ea   :  { %v2208_v49 = vsel %vm2207_vm2, %v2206_v19, %v2205_v47  ;;  %v2902_v35 = vld [vmem:[#allocation22 + $0x58] sm:$0xff]  ;;  %v2912_v19 = vld [vmem:[#allocation23 + $0x28] sm:$0xff]  ;;  %v2907_v47 = vld [vmem:[#allocation23] sm:$0xff] }
 0x4eb   :  { %v1910_v36 = vpop.f32.mrf.mxu1 }
 0x4ec   :  { %v2209_v45 = vrot.slane %v1910_v36, 5  ;;  %v2916_v36 = vld [vmem:[#allocation23 + $0x48] sm:$0xff] }
 0x4ed   :  { %v3609_v38 = vpop.f32.mrf.mxu1 }
 0x4ee   :  { %v2211_v53 = vsel %vm2210_vm3, %v2209_v45, %v2208_v49  ;;  %v2901_v38 = vld [vmem:[#allocation22 + $0x50] sm:$0xff]  ;;  %v2910_v45 = vld [vmem:[#allocation23 + $0x18] sm:$0xff] }
 0x4ef   :  { %v1980_v39 = vpop.f32.mrf.mxu1  ;;  %v3091_v49 = vld [vmem:[#allocation25 + $0x70] sm:$0xff] }
 0x4f0   :  { %v2212_v46 = vrot.slane %v1980_v39, 4  ;;  %v2915_v39 = vld [vmem:[#allocation23 + $0x40] sm:$0xff] }
 0x4f1   :  { %v3614_v40 = vpop.f32.mrf.mxu1 }
 0x4f2   :  { %v2214_v54 = vsel %vm2213_vm4, %v2212_v46, %v2211_v53  ;;  %v2900_v40 = vld [vmem:[#allocation22 + $0x48] sm:$0xff]  ;;  %v2909_v46 = vld [vmem:[#allocation23 + $0x10] sm:$0xff] }
 0x4f3   :  { %v2050_v41 = vpop.f32.mrf.mxu1  ;;  %v3087_v53 = vld [vmem:[#allocation25 + $0x50] sm:$0xff] }
 0x4f4   :  { %v2215_v48 = vrot.slane %v2050_v41, 3  ;;  %v2914_v41 = vld [vmem:[#allocation23 + $0x38] sm:$0xff] }
 0x4f5   :  { %v3619_v44 = vpop.f32.mrf.mxu1 }
 0x4f6   :  { %v2217_v37 = vsel %vm2216_vm5, %v2215_v48, %v2214_v54  ;;  %v2911_v44 = vld [vmem:[#allocation23 + $0x20] sm:$0xff]  ;;  %v3092_v48 = vld [vmem:[#allocation25 + $0x78] sm:$0xff]  ;;  %v3086_v54 = vld [vmem:[#allocation25 + $0x48] sm:$0xff] }
 0x4f7   :  { %v2120_v22 = vpop.f32.mrf.mxu1 }
 0x4f8   :  { %v2218_v50 = vrot.slane %v2120_v22, 2  ;;  %v2908_v22 = vld [vmem:[#allocation23 + $0x8] sm:$0xff] }
 0x4f9   :  { %v3624_v51 = vpop.f32.mrf.mxu1 }
 0x4fa   :  { %v2220_v58 = vsel %vm2219_vm6, %v2218_v50, %v2217_v37  ;;  %v3090_v50 = vld [vmem:[#allocation25 + $0x68] sm:$0xff]  ;;  %v3089_v51 = vld [vmem:[#allocation25 + $0x60] sm:$0xff] }
 0x4fb   :  { %v2190_v55 = vpop.f32.mrf.mxu1  ;;  %v3085_v37 = vld [vmem:[#allocation25 + $0x40] sm:$0xff] }
 0x4fc   :  { %v2221_v56 = vrot.slane %v2190_v55, 1  ;;  %v2899_v55 = vld [vmem:[#allocation22 + $0x40] sm:$0xff] }
 0x4fd   :  { %v3629_v57 = vpop.f32.mrf.mxu1 }
 0x4fe   :  { %v2223_v59 = vsel %vm2222_vm7, %v2221_v56, %v2220_v58  ;;  %v2898_v56 = vld [vmem:[#allocation22 + $0x38] sm:$0xff]  ;;  %v2897_v58 = vld [vmem:[#allocation22 + $0x30] sm:$0xff] }
 0x4ff   :  { %v2225_v43 = vsel %vm2194_vm8, %v2223_v59, -1e+30  ;;  %v3084_v57 = vld [vmem:[#allocation25 + $0x38] sm:$0xff]  ;;  %v3083_v59 = vld [vmem:[#allocation25 + $0x30] sm:$0xff] }
 0x500   :  { %v2227_v60 = vsel %vm2226_vm9, %v2225_v43, -inf }
 0x501   :  { %2228 = vmax.xlane.f32.xlu0 %v2227_v60  ;;  %v3082_v60 = vld [vmem:[#allocation25 + $0x28] sm:$0xff] }
 0x58a   :  { %v2229_v61 = vpop.xlane.xlu0 %2228 }
 0x58b   :  { %v2230_v63 = vsub.f32 %v2225_v43, %v2229_v61  ;;  %v2896_v43 = vld [vmem:[#allocation22 + $0x28] sm:$0xff]  ;;  %v2895_v61 = vld [vmem:[#allocation22 + $0x20] sm:$0xff] }
 0x58d   :  { %v2231_v1 = vmul.f32 1.442695, %v2230_v63  ;;  %v3081_v63 = vld [vmem:[#allocation25 + $0x20] sm:$0xff] }
 0x58f   :  { %3906 = vpow2.f32 %v2231_v1  ;;  %v2894_v1 = vld [vmem:[#allocation22 + $0x18] sm:$0xff] }
 0x59c   :  { %v3907_v3 = vpop.eup %3906 }
 0x59d   :  { %v2233_v4 = vmul.f32 %v3907_v3, %v1489_v52  ;;  %v3088_v52 = vld [vmem:[#allocation25 + $0x58] sm:$0xff] }
 0x59e   :  { %v3080_v3 = vld [vmem:[#allocation25 + $0x18] sm:$0xff] }
 0x59f   :  { %v2234_v6 = vsel %vm2226_vm9, %v2233_v4, 0.0 }
 0x5a0   :  { %2235 = vadd.xlane.f32.xlu1 %v2234_v6  ;;  %v3079_v6 = vld [vmem:[#allocation25 + $0x10] sm:$0xff] }
 0x629   :  { %v2236_v7 = vpop.xlane.xlu1 %2235 }
 0x62a   :  { %v2237_v8 = vmax.f32 %v2236_v7, 1e-30  ;;  %v2892_v7 = vld [vmem:[#allocation22 + $0x8] sm:$0xff] }
 0x62c   :  { %3908 = vrcp.f32 %v2237_v8  ;;  %v3078_v8 = vld [vmem:[#allocation25 + $0x8] sm:$0xff] }
 0x639   :  { %v3909_v9 = vpop.eup %3908 }
 0x63a   :  { %v2239_v10 = vmul.f32 %v3909_v9, %v2233_v4  ;;  %v2893_v4 = vld [vmem:[#allocation22 + $0x10] sm:$0xff]  ;;  %v2891_v9 = vld [vmem:[#allocation22] sm:$0xff] }
 0x63c   :  { %2890 = vst.msk [vmem:[#allocation31] sm:$0xff] %vm2226_vm9, %v2239_v10  ;;  %v2248_v11 = vrot.slane %v2239_v10, %v4772_v5  ;;  %v2241_v12 = vcombine.high %v2239_v10, %v2239_v10  ;;  %v3077_v10 = vld [vmem:[#allocation25] sm:$0xff] }
 0x63e   :  { %v2264_v15 = vrot.slane %v2248_v11, %v4772_v5  ;;  %v2256_v14 = vcombine.high %v2248_v11, %v2248_v11  ;;  %v2255_v18 = vrot.slane %v2241_v12, %v4772_v5 }
 0x640   :  { %3633 = vmatmul.mubr.msk.f32.vlgmr.msra.gmra.mxu0 %vm2226_vm9, %v2264_v15  ;;  %v2278_v17 = vrot.slane %v2256_v14, %v4772_v5  ;;  %v2286_v21 = vcombine.high %v2264_v15, %v2264_v15  ;;  %v2257_v25 = vcombine.high %v2255_v18, %v2255_v18 }
 0x641   :  { %3641 = vmatpush3.msra.mxu0 %v4780_v13  ;;  %3642 = vmatprep.mubr.msk.f32.mxu0 %vm4477_vm0, %v4475_v0  ;;  %v2271_v13 = vrot.slane %v2255_v18, %v4772_v5 }
 0x642   :  { %3638 = vmatmul.mubr.msk.f32.vlgmr.msra.gmra.mxu1 %vm2226_vm9, %v2278_v17  ;;  %3650 = vmatprep.subr.mxu0 %v4475_v0  ;;  %v2288_v23 = vcombine.high %v2278_v17, %v2278_v17 }
 0x643   :  { %3646 = vmatpush3.msra.mxu1 %v4786_v16  ;;  %3647 = vmatprep.mubr.msk.f32.mxu1 %vm4477_vm0, %v4475_v0  ;;  %v2285_v16 = vrot.slane %v2257_v25, %v4772_v5  ;;  %v2921_v5 = vld [vmem:[#allocation23 + $0x70] sm:$0xff] }
 0x644   :  { %3643 = vmatmul.mubr.msk.f32.vlgmr.msra.gmra.mxu0 %vm2226_vm9, %v2286_v21  ;;  %3655 = vmatprep.subr.mxu1 %v4475_v0 }
 0x645   :  { %3651 = vmatpush3.msra.mxu0 %v4793_v20  ;;  %3652 = vmatprep.mubr.msk.f32.mxu0 %vm4477_vm0, %v4475_v0  ;;  %v2287_v20 = vcombine.high %v2271_v13, %v2271_v13  ;;  %v2289_v27 = vcombine.high %v2285_v16, %v2285_v16 }
 0x646   :  { %3648 = vmatmul.mubr.msk.f32.vlgmr.msra.gmra.mxu1 %vm2226_vm9, %v2288_v23  ;;  %3660 = vmatprep.subr.mxu0 %v4475_v0 }
 0x647   :  { %3656 = vmatpush3.msra.mxu1 %v4800_v24  ;;  %3657 = vmatprep.mubr.msk.f32.mxu1 %vm4477_vm0, %v4475_v0  ;;  %v2922_v24 = vld [vmem:[#allocation23 + $0x78] sm:$0xff] }
 0x648   :  { %3653 = vmatmul.mubr.msk.f32.vlgmr.msra.gmra.mxu0 %vm2226_vm9, %v2271_v13  ;;  %3665 = vmatprep.subr.mxu1 %v4475_v0 }
 0x649   :  { %3661 = vmatpush3.msra.mxu0 %v4807_v26  ;;  %3662 = vmatprep.mubr.msk.f32.mxu0 %vm4477_vm0, %v4475_v0  ;;  %v2906_v26 = vld [vmem:[#allocation22 + $0x78] sm:$0xff] }
 0x64a   :  { %3658 = vmatmul.mubr.msk.f32.vlgmr.msra.gmra.mxu1 %vm2226_vm9, %v2285_v16  ;;  %3670 = vmatprep.subr.mxu0 %v4475_v0 }
 0x64b   :  { %3666 = vmatpush3.msra.mxu1 %v4813_v28  ;;  %3667 = vmatprep.mubr.msk.f32.mxu1 %vm4477_vm0, %v4475_v0  ;;  %v2905_v28 = vld [vmem:[#allocation22 + $0x70] sm:$0xff] }
 0x64c   :  { %3663 = vmatmul.mubr.msk.f32.vlgmr.msra.gmra.mxu0 %vm2226_vm9, %v2287_v20  ;;  %3705 = vmatprep.subr.mxu1 %v4475_v0 }
 0x64d   :  { %3671 = vmatpush3.msra.mxu0 %v2922_v24  ;;  %3702 = vmatprep.mubr.msk.f32.mxu0 %vm4477_vm0, %v4475_v0 }
 0x64e   :  { %3672 = vmatprep.subr.mxu0 %v4475_v0  ;;  %3668 = vmatmul.mubr.msk.f32.vlgmr.msra.gmra.mxu1 %vm2226_vm9, %v2289_v27 }
 0x64f   :  { %3673 = vmatpush3.msra.mxu0 %v2921_v5  ;;  %3706 = vmatpush3.msra.mxu1 %v2906_v26 }
 0x650   :  { %3674 = vmatprep.subr.mxu0 %v4475_v0  ;;  %3707 = vmatprep.subr.mxu1 %v4475_v0 }
 0x651   :  { %3675 = vmatpush3.msra.mxu0 %v2920_v29  ;;  %3708 = vmatpush3.msra.mxu1 %v2905_v28 }
 0x652   :  { %3676 = vmatprep.subr.mxu0 %v4475_v0  ;;  %3709 = vmatprep.subr.mxu1 %v4475_v0 }
 0x653   :  { %3677 = vmatpush3.msra.mxu0 %v2919_v30  ;;  %3710 = vmatpush3.msra.mxu1 %v2904_v31 }
 0x654   :  { %3678 = vmatprep.subr.mxu0 %v4475_v0  ;;  %3711 = vmatprep.subr.mxu1 %v4475_v0 }
 0x655   :  { %3679 = vmatpush3.msra.mxu0 %v2918_v32  ;;  %3712 = vmatpush3.msra.mxu1 %v2903_v33 }
 0x656   :  { %3680 = vmatprep.subr.mxu0 %v4475_v0  ;;  %3713 = vmatprep.subr.mxu1 %v4475_v0 }
 0x657   :  { %3681 = vmatpush3.msra.mxu0 %v2917_v34  ;;  %3714 = vmatpush3.msra.mxu1 %v2902_v35 }
 0x658   :  { %3682 = vmatprep.subr.mxu0 %v4475_v0  ;;  %3715 = vmatprep.subr.mxu1 %v4475_v0 }
 0x659   :  { %3683 = vmatpush3.msra.mxu0 %v2916_v36  ;;  %3716 = vmatpush3.msra.mxu1 %v2901_v38 }
 0x65a   :  { %3684 = vmatprep.subr.mxu0 %v4475_v0  ;;  %3717 = vmatprep.subr.mxu1 %v4475_v0 }
 0x65b   :  { %3685 = vmatpush3.msra.mxu0 %v2915_v39  ;;  %3718 = vmatpush3.msra.mxu1 %v2900_v40 }
 0x65c   :  { %3686 = vmatprep.subr.mxu0 %v4475_v0  ;;  %3719 = vmatprep.subr.mxu1 %v4475_v0 }
 0x65d   :  { %3687 = vmatpush3.msra.mxu0 %v2914_v41  ;;  %3737 = vmatprep.mubr.msk.f32.mxu1 %vm4477_vm0, %v4475_v0 }
 0x65e   :  { %3688 = vmatprep.subr.mxu0 %v4475_v0  ;;  %3720 = vmatpush3.msra.mxu1 %v2899_v55  ;;  %v3172_v55 = vld [vmem:[#allocation26 + $0x10] sm:$0xff] }
 0x65f   :  { %3689 = vmatpush3.msra.mxu0 %v2913_v42  ;;  %3721 = vmatprep.subr.mxu1 %v4475_v0  ;;  %v3185_v42 = vld [vmem:[#allocation26 + $0x78] sm:$0xff] }
 0x660   :  { %3690 = vmatprep.subr.mxu0 %v4475_v0  ;;  %3722 = vmatpush3.msra.mxu1 %v2898_v56  ;;  %v3171_v56 = vld [vmem:[#allocation26 + $0x8] sm:$0xff] }
 0x661   :  { %3691 = vmatpush3.msra.mxu0 %v2912_v19  ;;  %3723 = vmatprep.subr.mxu1 %v4475_v0 }
 0x662   :  { %3692 = vmatprep.subr.mxu0 %v4475_v0  ;;  %3724 = vmatpush3.msra.mxu1 %v2897_v58  ;;  %v3170_v58 = vld [vmem:[#allocation26] sm:$0xff] }
 0x663   :  { %3693 = vmatpush3.msra.mxu0 %v2911_v44  ;;  %3725 = vmatprep.subr.mxu1 %v4475_v0  ;;  %v3184_v44 = vld [vmem:[#allocation26 + $0x70] sm:$0xff] }
 0x664   :  { %3694 = vmatprep.subr.mxu0 %v4475_v0  ;;  %3726 = vmatpush3.msra.mxu1 %v2896_v43 }
 0x665   :  { %3695 = vmatpush3.msra.mxu0 %v2910_v45  ;;  %3727 = vmatprep.subr.mxu1 %v4475_v0  ;;  %v3183_v45 = vld [vmem:[#allocation26 + $0x68] sm:$0xff] }
 0x666   :  { %3696 = vmatprep.subr.mxu0 %v4475_v0  ;;  %3728 = vmatpush3.msra.mxu1 %v2895_v61 }
 0x667   :  { %3697 = vmatpush3.msra.mxu0 %v2909_v46  ;;  %3729 = vmatprep.subr.mxu1 %v4475_v0  ;;  %v3182_v46 = vld [vmem:[#allocation26 + $0x60] sm:$0xff] }
 0x668   :  { %3698 = vmatprep.subr.mxu0 %v4475_v0  ;;  %3730 = vmatpush3.msra.mxu1 %v2894_v1 }
 0x669   :  { %3699 = vmatpush3.msra.mxu0 %v2908_v22  ;;  %3731 = vmatprep.subr.mxu1 %v4475_v0  ;;  %v3181_v22 = vld [vmem:[#allocation26 + $0x58] sm:$0xff] }
 0x66a   :  { %3700 = vmatprep.subr.mxu0 %v4475_v0  ;;  %3732 = vmatpush3.msra.mxu1 %v2893_v4 }
 0x66b   :  { %3701 = vmatpush3.msra.mxu0 %v2907_v47  ;;  %3733 = vmatprep.subr.mxu1 %v4475_v0  ;;  %v3180_v47 = vld [vmem:[#allocation26 + $0x50] sm:$0xff] }
 0x66c   :  { %3703 = vmatmul.mubr.f32.vlgmr.msra.gmra.mxu0 %v4764_v62  ;;  %3740 = vmatprep.subr.mxu0 %v4475_v0 }
 0x66d   :  { %3741 = vmatpush3.msra.mxu0 %v3092_v48  ;;  %3772 = vmatprep.mubr.msk.f32.mxu0 %vm4477_vm0, %v4475_v0  ;;  %v3179_v48 = vld [vmem:[#allocation26 + $0x48] sm:$0xff] }
 0x66e   :  { %3742 = vmatprep.subr.mxu0 %v4475_v0  ;;  %3734 = vmatpush3.msra.mxu1 %v2892_v7 }
 0x66f   :  { %3743 = vmatpush3.msra.mxu0 %v3091_v49  ;;  %3735 = vmatprep.subr.mxu1 %v4475_v0  ;;  %v3178_v49 = vld [vmem:[#allocation26 + $0x40] sm:$0xff] }
 0x670   :  { %3744 = vmatprep.subr.mxu0 %v4475_v0  ;;  %3736 = vmatpush3.msra.mxu1 %v2891_v9 }
 0x671   :  { %3745 = vmatpush3.msra.mxu0 %v3090_v50  ;;  %3775 = vmatprep.subr.mxu1 %v4475_v0  ;;  %v3177_v50 = vld [vmem:[#allocation26 + $0x38] sm:$0xff] }
 0x672   :  { %3746 = vmatprep.subr.mxu0 %v4475_v0 }
 0x673   :  { %3747 = vmatpush3.msra.mxu0 %v3089_v51  ;;  %v3176_v51 = vld [vmem:[#allocation26 + $0x30] sm:$0xff] }
 0x674   :  { %3748 = vmatprep.subr.mxu0 %v4475_v0 }
 0x675   :  { %3749 = vmatpush3.msra.mxu0 %v3088_v52  ;;  %v3175_v52 = vld [vmem:[#allocation26 + $0x28] sm:$0xff] }
 0x676   :  { %3750 = vmatprep.subr.mxu0 %v4475_v0 }
 0x677   :  { %3751 = vmatpush3.msra.mxu0 %v3087_v53  ;;  %v3174_v53 = vld [vmem:[#allocation26 + $0x20] sm:$0xff] }
 0x678   :  { %3752 = vmatprep.subr.mxu0 %v4475_v0 }
 0x679   :  { %3753 = vmatpush3.msra.mxu0 %v3086_v54  ;;  %v3173_v54 = vld [vmem:[#allocation26 + $0x18] sm:$0xff] }
 0x67a   :  { %3754 = vmatprep.subr.mxu0 %v4475_v0 }
 0x67b   :  { %3755 = vmatpush3.msra.mxu0 %v3085_v37 }
 0x67c   :  { %3756 = vmatprep.subr.mxu0 %v4475_v0 }
 0x67d   :  { %3757 = vmatpush3.msra.mxu0 %v3084_v57 }
 0x67e   :  { %3758 = vmatprep.subr.mxu0 %v4475_v0 }
 0x67f   :  { %3759 = vmatpush3.msra.mxu0 %v3083_v59 }
 0x680   :  { %3760 = vmatprep.subr.mxu0 %v4475_v0 }
 0x681   :  { %3761 = vmatpush3.msra.mxu0 %v3082_v60 }
 0x682   :  { %3762 = vmatprep.subr.mxu0 %v4475_v0 }
 0x683   :  { %3763 = vmatpush3.msra.mxu0 %v3081_v63 }
 0x684   :  { %3764 = vmatprep.subr.mxu0 %v4475_v0 }
 0x685   :  { %3765 = vmatpush3.msra.mxu0 %v3080_v3 }
 0x686   :  { %3766 = vmatprep.subr.mxu0 %v4475_v0 }
 0x687   :  { %3767 = vmatpush3.msra.mxu0 %v3079_v6 }
 0x688   :  { %3768 = vmatprep.subr.mxu0 %v4475_v0 }
 0x689   :  { %3769 = vmatpush3.msra.mxu0 %v3078_v8 }
 0x68a   :  { %3770 = vmatprep.subr.mxu0 %v4475_v0 }
 0x68b   :  { %3771 = vmatpush3.msra.mxu0 %v3077_v10 }
 0x700   :  { %v2358_v11 = vpop.f32.mrf.mxu0 }
 0x702   :  { %v3634_v12 = vpop.f32.mrf.mxu0  ;;  %v2430_v15 = vpop.f32.mrf.mxu1 }
 0x703   :  { %v2874_v14 = vrot.slane %v2430_v15, 7 }
 0x704   :  { %v3639_v17 = vpop.f32.mrf.mxu1  ;;  %v2502_v18 = vpop.f32.mrf.mxu0 }
 0x705   :  { %v2875_v21 = vsel %vm2204_vm1, %v2874_v14, %v2358_v11  ;;  %v2876_v23 = vrot.slane %v2502_v18, 6 }
 0x706   :  { %v3644_v25 = vpop.f32.mrf.mxu0  ;;  %v2574_v13 = vpop.f32.mrf.mxu1 }
 0x707   :  { %v2877_v16 = vsel %vm2207_vm2, %v2876_v23, %v2875_v21  ;;  %v2878_v20 = vrot.slane %v2574_v13, 5 }
 0x708   :  { %v3649_v24 = vpop.f32.mrf.mxu1  ;;  %v2646_v27 = vpop.f32.mrf.mxu0 }
 0x709   :  { %v2879_v5 = vsel %vm2210_vm3, %v2878_v20, %v2877_v16  ;;  %v2880_v26 = vrot.slane %v2646_v27, 4 }
 0x70a   :  { %v3654_v29 = vpop.f32.mrf.mxu0  ;;  %v2718_v28 = vpop.f32.mrf.mxu1 }
 0x70b   :  { %v2881_v30 = vsel %vm2213_vm4, %v2880_v26, %v2879_v5  ;;  %v2882_v31 = vrot.slane %v2718_v28, 3 }
 0x70c   :  { %v3659_v32 = vpop.f32.mrf.mxu1  ;;  %v2790_v33 = vpop.f32.mrf.mxu0 }
 0x70d   :  { %v2883_v34 = vsel %vm2216_vm5, %v2882_v31, %v2881_v30  ;;  %v2884_v35 = vrot.slane %v2790_v33, 2 }
 0x70e   :  { %v3664_v36 = vpop.f32.mrf.mxu0  ;;  %v2862_v38 = vpop.f32.mrf.mxu1 }
 0x70f   :  { %v2885_v39 = vsel %vm2219_vm6, %v2884_v35, %v2883_v34  ;;  %v2886_v40 = vrot.slane %v2862_v38, 1 }
 0x710   :  { %v3669_v41 = vpop.f32.mrf.mxu1 }
 0x711   :  { %v2887_v19 = vsel %vm2222_vm7, %v2886_v40, %v2885_v39 }
 0x712   :  { %3738 = vmatmul.mubr.f32.vlgmr.msra.gmra.mxu1 %v2887_v19  ;;  %2889 = vst [vmem:[#allocation29] sm:$0xff] %v2887_v19  ;;  %3773 = vmatmul.mubr.f32.vlgmr.msra.gmra.mxu0 %v2887_v19 }
 0x713   :  { %3776 = vmatpush3.msra.mxu1 %v3185_v42  ;;  %3807 = vmatprep.mubr.msk.f32.mxu1 %vm4477_vm0, %v4475_v0 }
 0x714   :  { %3777 = vmatprep.subr.mxu1 %v4475_v0 }
 0x715   :  { %3778 = vmatpush3.msra.mxu1 %v3184_v44 }
 0x716   :  { %3779 = vmatprep.subr.mxu1 %v4475_v0 }
 0x717   :  { %3780 = vmatpush3.msra.mxu1 %v3183_v45 }
 0x718   :  { %3781 = vmatprep.subr.mxu1 %v4475_v0 }
 0x719   :  { %3782 = vmatpush3.msra.mxu1 %v3182_v46 }
 0x71a   :  { %3783 = vmatprep.subr.mxu1 %v4475_v0 }
 0x71b   :  { %3784 = vmatpush3.msra.mxu1 %v3181_v22 }
 0x71c   :  { %3785 = vmatprep.subr.mxu1 %v4475_v0 }
 0x71d   :  { %3786 = vmatpush3.msra.mxu1 %v3180_v47 }
 0x71e   :  { %3787 = vmatprep.subr.mxu1 %v4475_v0 }
 0x71f   :  { %3788 = vmatpush3.msra.mxu1 %v3179_v48 }
 0x720   :  { %3789 = vmatprep.subr.mxu1 %v4475_v0 }
 0x721   :  { %3790 = vmatpush3.msra.mxu1 %v3178_v49 }
 0x722   :  { %3791 = vmatprep.subr.mxu1 %v4475_v0 }
 0x723   :  { %3792 = vmatpush3.msra.mxu1 %v3177_v50 }
 0x724   :  { %3793 = vmatprep.subr.mxu1 %v4475_v0 }
 0x725   :  { %3794 = vmatpush3.msra.mxu1 %v3176_v51 }
 0x726   :  { %3795 = vmatprep.subr.mxu1 %v4475_v0 }
 0x727   :  { %3796 = vmatpush3.msra.mxu1 %v3175_v52 }
 0x728   :  { %3797 = vmatprep.subr.mxu1 %v4475_v0 }
 0x729   :  { %3798 = vmatpush3.msra.mxu1 %v3174_v53 }
 0x72a   :  { %3799 = vmatprep.subr.mxu1 %v4475_v0 }
 0x72b   :  { %3800 = vmatpush3.msra.mxu1 %v3173_v54 }
 0x72c   :  { %v4945_v37 = vpop.f32.mrf.mxu0  ;;  %3801 = vmatprep.subr.mxu1 %v4475_v0 }
 0x72d   :  { %3802 = vmatpush3.msra.mxu1 %v3172_v55 }
 0x72e   :  { %v3704_v57 = vpop.f32.mrf.mxu0  ;;  %3803 = vmatprep.subr.mxu1 %v4475_v0 }
 0x72f   :  { %3804 = vmatpush3.msra.mxu1 %v3171_v56 }
 0x730   :  { %3805 = vmatprep.subr.mxu1 %v4475_v0 }
 0x731   :  { %3806 = vmatpush3.msra.mxu1 %v3170_v58 }
 0x732   :  { %3808 = vmatmul.mubr.f32.vlgmr.msra.gmra.mxu1 %v4764_v62 }
 0x733   :  { %4247 = shalt.err (!%p4244_p0)
}
 0x734   :  { %s4986_s1 = sld [smem:[#allocation65_spill]]  ;;  %s4480_s9 = smov [#allocation35]  }
 0x735   :  { %s3327_s17 = sshll.u32 %s4480_s9, 4  ;;  %s3328_s17 = int_to_ptr.vmem [resolvable:$true] %s3327_s17 }
 0x736   :  { %s4256_s2 = scalar_lea.vmem %s3328_s17, 128  ;;  %p4261_p2 = scmp.lt.s32.totalorder %s3328_s17, %s3328_s17 }
 0x737   :  { %p4257_p1 = scmp.ne.s32.totalorder %s3328_s17, %s4256_s2  ;;  %p4262_p3 = scmp.lt.s32.totalorder %s4256_s2, %s4256_s2 }
 0x739   :  { %p4263_p4 = por %p4262_p3, %p4261_p2 }
 0x73a   :  { %3290 = dma.vmem_to_hbm [thread:$0]  %s3288_s23, 128, %s4986_s1, [#allocation30]  }
 0x73b   :  { %p4264_p5 = pnand %p4263_p4, %p4257_p1 }
 0x73d   :  { %4267 = shalt.err (!%p4264_p5)
}
 0x73e   :  { %3330 = dma.vmem_to_hbm [thread:$0]  %s3328_s17, 128, %s4640_s25, [#allocation36]  }
 0x73f   :  { %s4481_s7 = smov [#allocation31]  }
 0x740   :  { %s3297_s10 = sshll.u32 %s4481_s7, 4  ;;  %s3298_s10 = int_to_ptr.vmem [resolvable:$true] %s3297_s10 }
 0x741   :  { %s4276_s11 = scalar_lea.vmem %s3298_s10, 128  ;;  %p4281_p7 = scmp.lt.s32.totalorder %s3298_s10, %s3298_s10 }
 0x742   :  { %p4277_p6 = scmp.ne.s32.totalorder %s3298_s10, %s4276_s11  ;;  %p4282_p8 = scmp.lt.s32.totalorder %s4276_s11, %s4276_s11 }
 0x744   :  { %p4283_p9 = por %p4282_p8, %p4281_p7 }
 0x746   :  { %p4284_p10 = pnand %p4283_p9, %p4277_p6 }
 0x748   :  { %4287 = shalt.err (!%p4284_p10)
}
 0x749   :  { %s4987_s3 = sld [smem:[#allocation66_spill]]  ;;  %s4482_s14 = smov [#allocation37]  }
 0x74a   :  { %s3337_s19 = sshll.u32 %s4482_s14, 4  ;;  %s3338_s19 = int_to_ptr.vmem [resolvable:$true] %s3337_s19 }
 0x74b   :  { %s4296_s6 = scalar_lea.vmem %s3338_s19, 128  ;;  %p4301_p12 = scmp.lt.s32.totalorder %s3338_s19, %s3338_s19 }
 0x74c   :  { %p4297_p11 = scmp.ne.s32.totalorder %s3338_s19, %s4296_s6  ;;  %p4302_p13 = scmp.lt.s32.totalorder %s4296_s6, %s4296_s6 }
 0x74e   :  { %p4303_p0 = por %p4302_p13, %p4301_p12 }
 0x74f   :  { %3300 = dma.vmem_to_hbm [thread:$0]  %s3298_s10, 128, %s4987_s3, [#allocation30]  }
 0x750   :  { %p4304_p1 = pnand %p4303_p0, %p4297_p11 }
 0x752   :  { %4307 = shalt.err (!%p4304_p1)
}
 0x753   :  { %3340 = dma.vmem_to_hbm [thread:$0]  %s3338_s19, 128, %s4645_s5, [#allocation36]  }
 0x754   :  { %s4483_s25 = smov [#allocation38]  }
 0x755   :  { %s3347_s15 = sshll.u32 %s4483_s25, 4  ;;  %s3348_s15 = int_to_ptr.vmem [resolvable:$true] %s3347_s15 }
 0x756   :  { %s4316_s13 = scalar_lea.vmem %s3348_s15, 128  ;;  %p4321_p3 = scmp.lt.s32.totalorder %s3348_s15, %s3348_s15 }
 0x757   :  { %p4317_p2 = scmp.ne.s32.totalorder %s3348_s15, %s4316_s13  ;;  %p4322_p4 = scmp.lt.s32.totalorder %s4316_s13, %s4316_s13 }
 0x759   :  { %p4323_p5 = por %p4322_p4, %p4321_p3 }
 0x75b   :  { %p4324_p6 = pnand %p4323_p5, %p4317_p2 }
 0x75d   :  { %4327 = shalt.err (!%p4324_p6)
}
 0x75e   :  { %s4988_s24 = sld [smem:[#allocation59_spill]]  ;;  %s4484_s5 = smov [#allocation32]  }
 0x75f   :  { %s4989_s12 = sld [smem:[#allocation61_spill]]  ;;  %s4485_s26 = smov [#allocation28]  }
 0x760   :  { %s4990_s29 = sld [smem:[#allocation63_spill]]  ;;  %s3277_s16 = sshll.u32 %s4485_s26, 4  ;;  %s3278_s16 = int_to_ptr.vmem [resolvable:$true] %s3277_s16 }
 0x761   :  { %3350 = dma.vmem_to_hbm [thread:$0]  %s3348_s15, 128, %s4650_s20, [#allocation39]  }
 0x762   :  { %s3307_s20 = sshll.u32 %s4484_s5, 4  ;;  %s4486_s4 = smov [#allocation34]   ;;  %s3308_s20 = int_to_ptr.vmem [resolvable:$true] %s3307_s20 }
 0x763   :  { %s3317_s0 = sshll.u32 %s4486_s4, 4  ;;  %s4336_s28 = scalar_lea.vmem %s3308_s20, 128  ;;  %s3318_s0 = int_to_ptr.vmem [resolvable:$true] %s3317_s0 }
 0x764   :  { %v3434_v62 = vld [vmem:[%s4988_s24] ss:$0 sm:$0xff]  ;;  %p4337_p7 = scmp.ne.s32.totalorder %s3308_s20, %s4336_s28  ;;  %p4341_p8 = scmp.lt.s32.totalorder %s3308_s20, %s3308_s20 }
 0x765   :  { %v3436_v7 = vld [vmem:[%s4989_s12] ss:$0 sm:$0xff]  ;;  %p4342_p9 = scmp.lt.s32.totalorder %s4336_s28, %s4336_s28 }
 0x766   :  { %v3437_v8 = vld [vmem:[%s4990_s29] ss:$0 sm:$0xff] }
 0x767   :  { %p4343_p10 = por %p4342_p9, %p4341_p8 }
 0x769   :  { %p4344_p11 = pnand %p4343_p10, %p4337_p7 }
 0x7d2   :  { %v3059_v0 = vpop.f32.mrf.mxu1  ;;  %v3166_v59 = vpop.f32.mrf.mxu0 }
 0x7d3   :  { %v3060_v43 = vadd.f32 %v3059_v0, %v4945_v37  ;;  %v3167_v11 = vadd.f32 %v3436_v7, %v3166_v59 }
 0x7d4   :  { %v3739_v60 = vpop.f32.mrf.mxu1  ;;  %v3774_v61 = vpop.f32.mrf.mxu0 }
 0x7d5   :  { %v3070_v63 = vadd.f32 %v3434_v62, %v3060_v43 }
 0x7d7   :  { %v3435_v1 = vmul.f32 -1.442695, %v3070_v63 }
 0x7d9   :  { %3910 = vpow2.f32 %v3435_v1 }
 0x7e6   :  { %v3911_v3 = vpop.eup %3910 }
 0x7e7   :  { %v3074_v4 = vadd.f32 1.0, %v3911_v3 }
 0x7e9   :  { %3912 = vrcp.f32 %v3074_v4 }
 0x7f2   :  { %v3259_v6 = vpop.f32.mrf.mxu1 }
 0x7f3   :  { %v3260_v12 = vadd.f32 %v3437_v8, %v3259_v6 }
 0x7f4   :  { %v3809_v9 = vpop.f32.mrf.mxu1 }
 0x7f6   :  { %v3913_v10 = vpop.eup %3912 }
 0x7f7   :  { %v3264_v15 = vsub.f32 1.0, %v3913_v10  ;;  %v3263_v14 = vmul.f32 %v3913_v10, %v3167_v11 }
 0x7f9   :  { %v3265_v17 = vmul.f32 %v3264_v15, %v3260_v12 }
 0x7fb   :  { %v3266_v18 = vadd.f32 %v3265_v17, %v3263_v14 }
 0x7fd   :  { %3914 = vtanh.f32 %v3266_v18 }
 0x80a   :  { %v3915_v21 = vpop.eup %3914 }
 0x80b   :  { %v3268_v23 = vmul.f32 %v3915_v21, %v4731_v2 }
 0x80d   :  { %3269 = vst [vmem:[#allocation32] sm:$0xff] %v3268_v23  ;;  %3270 = vst [vmem:[#allocation28] sm:$0xff] %v3268_v23 }
 0x80e   :  { %4347 = shalt.err (!%p4344_p11)
}
 0x80f   :  { %s4991_s18 = sld [smem:[#allocation67_spill]]  ;;  %s4356_s27 = scalar_lea.vmem %s3278_s16, 128 }
 0x810   :  { %p4357_p12 = scmp.ne.s32.totalorder %s3278_s16, %s4356_s27  ;;  %p4361_p13 = scmp.lt.s32.totalorder %s3278_s16, %s3278_s16 }
 0x811   :  { %p4362_p0 = scmp.lt.s32.totalorder %s4356_s27, %s4356_s27 }
 0x813   :  { %p4363_p1 = por %p4362_p0, %p4361_p13 }
 0x815   :  { %3310 = dma.vmem_to_hbm [thread:$0]  %s3308_s20, 128, %s4991_s18, [#allocation33]  }
 0x816   :  { %p4364_p2 = pnand %p4363_p1, %p4357_p12 }
 0x818   :  { %4367 = shalt.err (!%p4364_p2)
}
 0x819   :  { %s4992_s30 = sld [smem:[#allocation64_spill]]  ;;  %s4376_s22 = scalar_lea.vmem %s3318_s0, 128 }
 0x81a   :  { %p4377_p3 = scmp.ne.s32.totalorder %s3318_s0, %s4376_s22  ;;  %p4381_p4 = scmp.lt.s32.totalorder %s3318_s0, %s3318_s0 }
 0x81b   :  { %p4382_p5 = scmp.lt.s32.totalorder %s4376_s22, %s4376_s22 }
 0x81d   :  { %p4383_p6 = por %p4382_p5, %p4381_p4 }
 0x81f   :  { %3280 = dma.vmem_to_hbm [thread:$0]  %s3278_s16, 128, %s4992_s30, [#allocation4]  }
 0x820   :  { %p4384_p8 = pnand %p4383_p6, %p4377_p3 }
 0x822   :  { %4387 = shalt.err (!%p4384_p8)
}
 0x823   :  { %3320 = dma.vmem_to_hbm [thread:$0]  %s3318_s0, 128, %s4635_s21, [#allocation33]  }
 0x824   :  { %4414 = dma.done.wait [#allocation4], 128  }
 0x825   :  { %4415 = vsyncadd [#allocation4], 4294967168 }
 0x826   :  { %4416 = dma.done.wait [#allocation30], 256  }
 0x827   :  { %4417 = vsyncadd [#allocation30], 4294967040 }
 0x828   :  { %4418 = dma.done.wait [#allocation33], 256  }
 0x829   :  { %4419 = vsyncadd [#allocation33], 4294967040 }
 0x82a   :  { %4420 = dma.done.wait [#allocation36], 256  }
 0x82b   :  { %4421 = vsyncadd [#allocation36], 4294967040 }
 0x82c   :  { %4422 = dma.done.wait [#allocation39], 128  }
 0x82d   :  { %4423 = vsyncadd [#allocation39], 4294967168 }
 0x82e   :  { %3375 = vsyncpa [#allocation3], 1 }
 0x82f   :  { %3376 = vsyncpa [#allocation6], 1 }
 0x830   :  { %3377 = vsyncpa [#allocation9], 1 }
 0x831   :  { %3378 = vsyncpa [#allocation12], 1 }
 0x832   :  { %3379 = vsyncpa [#allocation15], 1 }
 0x833   :  { %3380 = vsyncpa [#allocation18], 1 }
 0x834   :  { %3381 = vsyncpa [#allocation21], 1 }
 0x835   :  { %3382 = vsyncpa [#allocation24], 1 }
 0x836   :  { %3383 = vsyncpa [#allocation27], 1 }
 0x837   :  { %3384 = vsyncpa [#allocation4], 1 }
 0x838   :  { %3385 = vsyncpa [#allocation30], 1 }
 0x839   :  { %3386 = vsyncpa [#allocation33], 1 }
 0x83a   :  { %3387 = vsyncpa [#allocation36], 1 }
 0x83b   :  { %3388 = vsyncpa [#allocation39], 1 }

</bundles_post_ra>
